<compile_context>
chip_gen: v7x
topology: tpu7x:2x2x1
jax: 0.10.0
libtpu: 0.0.40
codegen_flags: <defaults>
</compile_context>

<pallas_src>
import jax
import jax.numpy as jnp
from jax.experimental import pallas as pl
from jax.experimental.pallas import tpu as pltpu

# ---------------- sizes (small, consistent with the module) ----------------
B = 2            # batch
N = 128          # points per cloud
CIN = 3          # xyz
CIN_PAD = 8      # layer-1 K padded to 8 so it is a single MXU pass
C1, C2, C3 = 64, 128, 256   # encoder widths; encoder.output_dim = C3
H = 256          # head hidden
CLS = 16         # cls_dim
OUT_PAD = 256    # lane-dense padded logits width (sliced back to CLS in the wrapper)
B_PAD = 8        # sublane-dense padded batch rows for head matmuls / output store
EPS = 1e-5


# ------------- fused kernel: encoder + max-pool + classification head -------------
def pointnet_cls_kernel(x_ref, w1_ref, w2_ref, wstk_ref, bias_ref, o_ref):
    # x_ref   : (B*N, 8)      f32   (xyz zero-padded to 8 lanes)
    # w1_ref  : (8, 64)       f32   (BN folded)
    # w2_ref  : (64, 128)     bf16  (BN folded)
    # wstk_ref: (4, 256, 256) bf16  [0]=w3 (rows 0:128 valid), [1]=w4, [2]=w5, [3]=w6 (cols 0:CLS valid)
    # bias_ref: (8, 256)      f32   rows 0..5 = b1..b6 (zero-padded), rows 6..7 = 0
    # o_ref   : (8, 256)      f32   rows 0:B, cols 0:CLS valid

    # ----- encoder on the whole (B*N, C) slab -----
    # Layer 1: padded K=8 MXU matmul (f32 operands; tiny).
    h = jnp.dot(x_ref[...], w1_ref[...], preferred_element_type=jnp.float32)   # (256, 64)
    h = jnp.maximum(h + bias_ref[0:1, 0:C1], 0.0)                              # Conv+BN+ReLU

    # Layer 2: bf16 operands, f32 accumulation; bias/ReLU in f32.
    h = jnp.dot(h.astype(jnp.bfloat16), w2_ref[...],
                preferred_element_type=jnp.float32)                            # (256, 128)
    h = jnp.maximum(h + bias_ref[1:2, 0:C2], 0.0)

    # Layer 3.
    h = jnp.dot(h.astype(jnp.bfloat16), wstk_ref[0, 0:C2, :],
                preferred_element_type=jnp.float32)                            # (256, 256)
    h = jnp.maximum(h + bias_ref[2:3, :], 0.0)

    # ----- global max-pool over points: one fused sublane reduce -----
    g = jnp.max(h.reshape(B, N, C3), axis=1)                                   # (B, 256)
    # Pad batch rows to a full 8-sublane tile (head matmuls + final store stay dense;
    # padded rows are discarded by the wrapper slice).
    g = jnp.concatenate([g, jnp.zeros((B_PAD - B, C3), jnp.float32)], axis=0)  # (8, 256)

    # ----- classification head (Dropout is identity in eval mode) -----
    t = jnp.dot(g.astype(jnp.bfloat16), wstk_ref[1],
                preferred_element_type=jnp.float32)
    t = jnp.maximum(t + bias_ref[3:4, :], 0.0)
    t = jnp.dot(t.astype(jnp.bfloat16), wstk_ref[2],
                preferred_element_type=jnp.float32)
    t = jnp.maximum(t + bias_ref[4:5, :], 0.0)
    o = jnp.dot(t.astype(jnp.bfloat16), wstk_ref[3],
                preferred_element_type=jnp.float32)
    o_ref[...] = o + bias_ref[5:6, :]                                          # full-tile store


def pointnet_cls_forward(x_ncw, params):
    # x_ncw: (B, 3, N) PyTorch NCW layout -> (B*N, 8) slab (rows grouped per batch element,
    # which the in-kernel max-pool reshape relies on).
    w1p, w2b, wstk, bias = params
    x_slab = jnp.transpose(x_ncw, (0, 2, 1)).astype(jnp.float32).reshape(B * N, CIN)
    x_pad = jnp.pad(x_slab, ((0, 0), (0, CIN_PAD - CIN)))

    vmem = pl.BlockSpec(memory_space=pltpu.MemorySpace.VMEM)
    logits_pad = pl.pallas_call(
        pointnet_cls_kernel,
        out_shape=jax.ShapeDtypeStruct((B_PAD, OUT_PAD), jnp.float32),
        in_specs=[vmem] * 5,
        out_specs=vmem,
    )(x_pad, w1p, w2b, wstk, bias)
    return logits_pad[:B, :CLS]          # (B, cls_dim)


# ------------- parameter construction (deterministic, BN folded in f32) -------------
def fold_bn_into_weight(w, bias, gamma, beta, mean, var):
    """Fold eval-mode BatchNorm after an affine layer into weight columns + bias (f32)."""
    scale = gamma / jnp.sqrt(var + EPS)          # (Cout,)
    return w * scale[None, :], (bias - mean) * scale + beta


def make_params(key):
    ks = jax.random.split(key, 12)
    std = 0.02

    def lin(k, cin, cout):
        return jax.random.normal(k, (cin, cout), jnp.float32) * std

    def bn(k, c):
        kg, kb, km, kv = jax.random.split(k, 4)
        gamma = 1.0 + 0.1 * jax.random.normal(kg, (c,), jnp.float32)
        beta = 0.1 * jax.random.normal(kb, (c,), jnp.float32)
        mean = 0.1 * jax.random.normal(km, (c,), jnp.float32)
        var = jnp.abs(1.0 + 0.1 * jax.random.normal(kv, (c,), jnp.float32))
        return gamma, beta, mean, var

    zeros = lambda c: jnp.zeros((c,), jnp.float32)

    # encoder: three 1x1 convs (bias=0 per trunc_normal init) each followed by BN
    w1, b1 = fold_bn_into_weight(lin(ks[0], CIN, C1), zeros(C1), *bn(ks[1], C1))
    w2, b2 = fold_bn_into_weight(lin(ks[2], C1, C2), zeros(C2), *bn(ks[3], C2))
    w3, b3 = fold_bn_into_weight(lin(ks[4], C2, C3), zeros(C3), *bn(ks[5], C3))
    # head: Linear(256,256)+BN, Linear(256,256)+BN, Linear(256,cls_dim)
    w4, b4 = fold_bn_into_weight(lin(ks[6], C3, H), zeros(H), *bn(ks[7], H))
    w5, b5 = fold_bn_into_weight(lin(ks[8], H, H), zeros(H), *bn(ks[9], H))
    w6 = lin(ks[10], H, CLS)
    b6 = zeros(CLS)                       # module init: Linear bias = 0 (kept generic in the slab)

    # ---- pack into 5 kernel inputs (fold in f32 above, cast to bf16 here) ----
    w1p = jnp.pad(w1, ((0, CIN_PAD - CIN), (0, 0)))                      # (8, 64)   f32
    w2b = w2.astype(jnp.bfloat16)                                        # (64, 128) bf16
    w3p = jnp.pad(w3, ((0, H - C2), (0, 0)))                             # rows padded 128->256
    w6p = jnp.pad(w6, ((0, 0), (0, OUT_PAD - CLS)))                      # cols padded 16->256
    wstk = jnp.stack([w3p, w4, w5, w6p], axis=0).astype(jnp.bfloat16)    # (4, 256, 256) bf16

    pad_row = lambda b: jnp.pad(b, (0, H - b.shape[0]))
    bias = jnp.stack([pad_row(b1), pad_row(b2), b3, b4, b5, pad_row(b6),
                      jnp.zeros((H,), jnp.float32), jnp.zeros((H,), jnp.float32)],
                     axis=0)                                             # (8, 256) f32

    return (w1p, w2b, wstk, bias)


if __name__ == "__main__":
    key = jax.random.PRNGKey(0)
    k_x, k_p = jax.random.split(key)
    x = jax.random.normal(k_x, (B, CIN, N), jnp.float32)   # (B, 3, N) point cloud
    params = make_params(k_p)

    logits = pointnet_cls_forward(x, params)
    jax.block_until_ready(logits)
    assert logits.shape == (B, CLS)
    print("KERNEL_OK")
</pallas_src>

<mosaic_0001>
module attributes {stable_mosaic.version = 11 : i64} {
  func.func @pointnet_cls_kernel(%arg0: memref<256x8xf32, #tpu.memory_space<vmem>>, %arg1: memref<8x64xf32, #tpu.memory_space<vmem>>, %arg2: memref<64x128xbf16, #tpu.memory_space<vmem>>, %arg3: memref<4x256x256xbf16, #tpu.memory_space<vmem>>, %arg4: memref<8x256xf32, #tpu.memory_space<vmem>>, %arg5: memref<8x256xf32, #tpu.memory_space<vmem>>) attributes {dimension_semantics = [], scalar_prefetch = 0 : i64, scratch_operands = 0 : i64, tpu.core_type = #tpu.core_type<tc>} {
    %c0 = arith.constant 0 : index
    %c0_0 = arith.constant 0 : index
    %0 = vector.load %arg0[%c0, %c0_0] : memref<256x8xf32, #tpu.memory_space<vmem>>, vector<256x8xf32>
    %c0_1 = arith.constant 0 : index
    %c0_2 = arith.constant 0 : index
    %1 = vector.load %arg1[%c0_1, %c0_2] : memref<8x64xf32, #tpu.memory_space<vmem>>, vector<8x64xf32>
    %cst = arith.constant dense<0.000000e+00> : vector<256x64xf32>
    %2 = tpu.matmul %0, %1, %cst {dimension_numbers = #tpu.dot_dimension_numbers<[1], [0], [0], [1], [0, 0, 1, 1], [], []>} : vector<256x8xf32>, vector<8x64xf32>, vector<256x64xf32> -> vector<256x64xf32>
    %c0_3 = arith.constant 0 : index
    %c0_4 = arith.constant 0 : index
    %3 = vector.load %arg4[%c0_3, %c0_4] : memref<8x256xf32, #tpu.memory_space<vmem>>, vector<1x64xf32>
    %4 = vector.broadcast %3 : vector<1x64xf32> to vector<256x64xf32>
    %5 = arith.addf %2, %4 : vector<256x64xf32>
    %cst_5 = arith.constant 0.000000e+00 : f32
    %6 = vector.broadcast %cst_5 : f32 to vector<256x64xf32>
    %7 = arith.maximumf %5, %6 : vector<256x64xf32>
    %8 = arith.truncf %7 : vector<256x64xf32> to vector<256x64xbf16>
    %c0_6 = arith.constant 0 : index
    %c0_7 = arith.constant 0 : index
    %9 = vector.load %arg2[%c0_6, %c0_7] : memref<64x128xbf16, #tpu.memory_space<vmem>>, vector<64x128xbf16>
    %cst_8 = arith.constant dense<0.000000e+00> : vector<256x128xf32>
    %10 = tpu.matmul %8, %9, %cst_8 {dimension_numbers = #tpu.dot_dimension_numbers<[1], [0], [0], [1], [0, 0, 1, 1], [], []>} : vector<256x64xbf16>, vector<64x128xbf16>, vector<256x128xf32> -> vector<256x128xf32>
    %c1 = arith.constant 1 : index
    %c0_9 = arith.constant 0 : index
    %11 = vector.load %arg4[%c1, %c0_9] : memref<8x256xf32, #tpu.memory_space<vmem>>, vector<1x128xf32>
    %12 = vector.broadcast %11 : vector<1x128xf32> to vector<256x128xf32>
    %13 = arith.addf %10, %12 : vector<256x128xf32>
    %cst_10 = arith.constant 0.000000e+00 : f32
    %14 = vector.broadcast %cst_10 : f32 to vector<256x128xf32>
    %15 = arith.maximumf %13, %14 : vector<256x128xf32>
    %16 = arith.truncf %15 : vector<256x128xf32> to vector<256x128xbf16>
    %c0_11 = arith.constant 0 : index
    %c0_12 = arith.constant 0 : index
    %c0_13 = arith.constant 0 : index
    %17 = vector.load %arg3[%c0_11, %c0_12, %c0_13] : memref<4x256x256xbf16, #tpu.memory_space<vmem>>, vector<1x128x256xbf16>
    %18 = vector.shape_cast %17 : vector<1x128x256xbf16> to vector<128x256xbf16>
    %cst_14 = arith.constant dense<0.000000e+00> : vector<256x256xf32>
    %19 = tpu.matmul %16, %18, %cst_14 {dimension_numbers = #tpu.dot_dimension_numbers<[1], [0], [0], [1], [0, 0, 1, 1], [], []>} : vector<256x128xbf16>, vector<128x256xbf16>, vector<256x256xf32> -> vector<256x256xf32>
    %c2 = arith.constant 2 : index
    %c0_15 = arith.constant 0 : index
    %20 = vector.load %arg4[%c2, %c0_15] : memref<8x256xf32, #tpu.memory_space<vmem>>, vector<1x256xf32>
    %21 = vector.broadcast %20 : vector<1x256xf32> to vector<256x256xf32>
    %22 = arith.addf %19, %21 : vector<256x256xf32>
    %cst_16 = arith.constant 0.000000e+00 : f32
    %23 = vector.broadcast %cst_16 : f32 to vector<256x256xf32>
    %24 = arith.maximumf %22, %23 : vector<256x256xf32>
    %25 = vector.shape_cast %24 : vector<256x256xf32> to vector<2x128x256xf32>
    %cst_17 = arith.constant dense<0xFF800000> : vector<2x256xf32>
    %26 = vector.multi_reduction <maximumf>, %25, %cst_17 [1] : vector<2x128x256xf32> to vector<2x256xf32>
    %cst_18 = arith.constant 0.000000e+00 : f32
    %27 = vector.broadcast %cst_18 : f32 to vector<6x256xf32>
    %28 = tpu.concatenate %26, %27 in 0 : vector<2x256xf32>, vector<6x256xf32> -> vector<8x256xf32>
    %29 = arith.truncf %28 : vector<8x256xf32> to vector<8x256xbf16>
    %c1_19 = arith.constant 1 : index
    %c0_20 = arith.constant 0 : index
    %c0_21 = arith.constant 0 : index
    %30 = vector.load %arg3[%c1_19, %c0_20, %c0_21] : memref<4x256x256xbf16, #tpu.memory_space<vmem>>, vector<1x256x256xbf16>
    %31 = vector.shape_cast %30 : vector<1x256x256xbf16> to vector<256x256xbf16>
    %cst_22 = arith.constant dense<0.000000e+00> : vector<8x256xf32>
    %32 = tpu.matmul %29, %31, %cst_22 {dimension_numbers = #tpu.dot_dimension_numbers<[1], [0], [0], [1], [0, 0, 1, 1], [], []>} : vector<8x256xbf16>, vector<256x256xbf16>, vector<8x256xf32> -> vector<8x256xf32>
    %c3 = arith.constant 3 : index
    %c0_23 = arith.constant 0 : index
    %33 = vector.load %arg4[%c3, %c0_23] : memref<8x256xf32, #tpu.memory_space<vmem>>, vector<1x256xf32>
    %34 = vector.broadcast %33 : vector<1x256xf32> to vector<8x256xf32>
    %35 = arith.addf %32, %34 : vector<8x256xf32>
    %cst_24 = arith.constant 0.000000e+00 : f32
    %36 = vector.broadcast %cst_24 : f32 to vector<8x256xf32>
    %37 = arith.maximumf %35, %36 : vector<8x256xf32>
    %38 = arith.truncf %37 : vector<8x256xf32> to vector<8x256xbf16>
    %c2_25 = arith.constant 2 : index
    %c0_26 = arith.constant 0 : index
    %c0_27 = arith.constant 0 : index
    %39 = vector.load %arg3[%c2_25, %c0_26, %c0_27] : memref<4x256x256xbf16, #tpu.memory_space<vmem>>, vector<1x256x256xbf16>
    %40 = vector.shape_cast %39 : vector<1x256x256xbf16> to vector<256x256xbf16>
    %cst_28 = arith.constant dense<0.000000e+00> : vector<8x256xf32>
    %41 = tpu.matmul %38, %40, %cst_28 {dimension_numbers = #tpu.dot_dimension_numbers<[1], [0], [0], [1], [0, 0, 1, 1], [], []>} : vector<8x256xbf16>, vector<256x256xbf16>, vector<8x256xf32> -> vector<8x256xf32>
    %c4 = arith.constant 4 : index
    %c0_29 = arith.constant 0 : index
    %42 = vector.load %arg4[%c4, %c0_29] : memref<8x256xf32, #tpu.memory_space<vmem>>, vector<1x256xf32>
    %43 = vector.broadcast %42 : vector<1x256xf32> to vector<8x256xf32>
    %44 = arith.addf %41, %43 : vector<8x256xf32>
    %cst_30 = arith.constant 0.000000e+00 : f32
    %45 = vector.broadcast %cst_30 : f32 to vector<8x256xf32>
    %46 = arith.maximumf %44, %45 : vector<8x256xf32>
    %47 = arith.truncf %46 : vector<8x256xf32> to vector<8x256xbf16>
    %c3_31 = arith.constant 3 : index
    %c0_32 = arith.constant 0 : index
    %c0_33 = arith.constant 0 : index
    %48 = vector.load %arg3[%c3_31, %c0_32, %c0_33] : memref<4x256x256xbf16, #tpu.memory_space<vmem>>, vector<1x256x256xbf16>
    %49 = vector.shape_cast %48 : vector<1x256x256xbf16> to vector<256x256xbf16>
    %cst_34 = arith.constant dense<0.000000e+00> : vector<8x256xf32>
    %50 = tpu.matmul %47, %49, %cst_34 {dimension_numbers = #tpu.dot_dimension_numbers<[1], [0], [0], [1], [0, 0, 1, 1], [], []>} : vector<8x256xbf16>, vector<256x256xbf16>, vector<8x256xf32> -> vector<8x256xf32>
    %c5 = arith.constant 5 : index
    %c0_35 = arith.constant 0 : index
    %51 = vector.load %arg4[%c5, %c0_35] : memref<8x256xf32, #tpu.memory_space<vmem>>, vector<1x256xf32>
    %52 = vector.broadcast %51 : vector<1x256xf32> to vector<8x256xf32>
    %53 = arith.addf %50, %52 : vector<8x256xf32>
    %c0_36 = arith.constant 0 : index
    %c0_37 = arith.constant 0 : index
    %54 = vector.load %arg5[%c0_36, %c0_37] : memref<8x256xf32, #tpu.memory_space<vmem>>, vector<8x256xf32>
    tpu.vector_store %arg5[%c0_36, %c0_37], %53 {strides = array<i32>} : memref<8x256xf32, #tpu.memory_space<vmem>>, vector<8x256xf32>,
    return
  }
}

</mosaic_0001>

<bundles_post_ra>
// kernel: tpu_custom_call.1
= control target key start
LH: loop header
LB: loop body
LE: loop exit
PB: predicated region body
PF: predicated region fallthrough
CT: control target
= control target key end

     0   :  { %10 = vsyncpa [#allocation3], 0  ;;  %s2925_s0 = inlined_call_operand.vmem [shape: f32[256,8], index: 0, kind: input, shape index: {}]   ;;  %s2926_s1 = inlined_call_operand.vmem [shape: f32[8,64], index: 1, kind: input, shape index: {}]   ;;  %s2927_s2 = inlined_call_operand.vmem [shape: bf16[64,128], index: 2, kind: input, shape index: {}]   ;;  %s2928_s3 = inlined_call_operand.hbm [shape: bf16[4,256,256], index: 3, kind: input, shape index: {}]   ;;  %s2929_s4 = inlined_call_operand.vmem [shape: f32[8,256], index: 4, kind: input, shape index: {}]   ;;  %s2930_s5 = inlined_call_operand.hbm [shape: f32[8,256], index: 5, kind: output, shape index: {}]  }
   0x1   :  { %11 = vsyncpa [#allocation4], 0  ;;  %s2505_s18 = smov [#allocation2]   ;;  %s2457_s22 = scalar_lea.hbm %s2928_s3, 16384 }
   0x2   :  { %s23_s19 = sshll.u32 %s2505_s18, 4  ;;  %p2458_p0 = scmp.ne.s32.totalorder %s2928_s3, %s2457_s22  ;;  %s24_s19 = int_to_ptr.vmem [resolvable:$true] %s23_s19 }
   0x3   :  { %p2461_p1 = scmp.lt.u32.totalorder %s2457_s22, %s2928_s3 }
   0x5   :  { %p2463_p2 = pnand %p2461_p1, %p2458_p0 }
   0x7   :  { %2466 = shalt.err (!%p2463_p2)
}
   0x8   :  { %s2467_s27 = scalar_lea.vmem %s24_s19, 16384  ;;  %p2472_p4 = scmp.lt.s32.totalorder %s24_s19, %s24_s19 }
   0x9   :  { %p2468_p3 = scmp.ne.s32.totalorder %s24_s19, %s2467_s27  ;;  %p2473_p5 = scmp.lt.s32.totalorder %s2467_s27, %s2467_s27 }
   0xb   :  { %p2474_p6 = por %p2473_p5, %p2472_p4 }
   0xd   :  { %p2475_p7 = pnand %p2474_p6, %p2468_p3 }
   0xf   :  { %2478 = shalt.err (!%p2475_p7)
}
  0x10   :  { %s2506_s28 = smov 128   ;;  %s2507_s29 = smov 8  }
  0x11   :  { %29 = dma.hbm_to_vmem [thread:$0]  %s2928_s3, 16384, %s24_s19, [#allocation3], %s2506_s28, %s2506_s28, %s2507_s29  }
  0x12   :  { %2501 = dma.done.wait [#allocation3], 16384  }
  0x13   :  { %2502 = vsyncadd [#allocation3], 4294950912  ;;  %vm70_vm0 = vcmask 64512   ;;  %v68_v0 = vld [vmem:[%s2926_s1] sm:$0xff]  ;;  %v37_v2 = vld [vmem:[%s2925_s0 + $0x8] sm:$0xff]  ;;  %vm473_vm1 = vcmask 523264  }
  0x14   :  { %v36_v1 = vld [vmem:[%s2925_s0] sm:$0xff]  ;;  %2188 = vmatprep.subr.mxu0 %v68_v0  ;;  %v38_v3 = vld [vmem:[%s2925_s0 + $0x10] sm:$0xff]  ;;  %2278 = vmatprep.subr.mxu1 %v68_v0  ;;  %v39_v4 = vld [vmem:[%s2925_s0 + $0x18] sm:$0xff]  ;;  %vm1185_vm2 = vcmask 1041409   ;;  %vm1190_vm3 = vcmask 1041408   ;;  %s2509_s10 = smov [#allocation5]  }
  0x15   :  { %2190 = vmatprep.mubr.msk.f32.mxu0 %vm70_vm0, %v36_v1  ;;  %2189 = vmatpush3.msra.mxu0 %v68_v0  ;;  %v40_v5 = vld [vmem:[%s2925_s0 + $0x20] sm:$0xff]  ;;  %v53_v7 = vld [vmem:[%s2925_s0 + $0x88] sm:$0xff]  ;;  %v54_v8 = vld [vmem:[%s2925_s0 + $0x90] sm:$0xff]  ;;  %s1952_s11 = sshll.u32 %s2509_s10, 4  ;;  %s1953_s11 = int_to_ptr.vmem [resolvable:$true] %s1952_s11 }
  0x16   :  { %2191 = vmatmul.mubr.msk.f32.vlgmr.msra.gmra.mrb[0].mxu0 %vm70_vm0, %v37_v2  ;;  %2279 = vmatpush3.msra.mxu1 %v68_v0  ;;  %v52_v6 = vld [vmem:[%s2925_s0 + $0x80] sm:$0xff]  ;;  %v41_v9 = vld [vmem:[%s2925_s0 + $0x28] sm:$0xff]  ;;  %v55_v10 = vld [vmem:[%s2925_s0 + $0x98] sm:$0xff]  ;;  %s2479_s12 = scalar_lea.vmem %s1953_s11, 256  ;;  %p2484_p9 = scmp.lt.s32.totalorder %s1953_s11, %s1953_s11 }
  0x17   :  { %2193 = vmatprep.mubr.msk.f32.mxu0 %vm70_vm0, %v38_v3  ;;  %2214 = vmatprep.mubr.msk.f32.mxu1 %vm70_vm0, %v52_v6  ;;  %v42_v11 = vld [vmem:[%s2925_s0 + $0x30] sm:$0xff]  ;;  %v56_v12 = vld [vmem:[%s2925_s0 + $0xa0] sm:$0xff]  ;;  %v43_v13 = vld [vmem:[%s2925_s0 + $0x38] sm:$0xff]  ;;  %p2480_p8 = scmp.ne.s32.totalorder %s1953_s11, %s2479_s12  ;;  %p2485_p10 = scmp.lt.s32.totalorder %s2479_s12, %s2479_s12 }
  0x18   :  { %2215 = vmatmul.mubr.msk.f32.vlgmr.msra.gmra.mrb[0].mxu1 %vm70_vm0, %v53_v7  ;;  %v57_v14 = vld [vmem:[%s2925_s0 + $0xa8] sm:$0xff]  ;;  %v44_v15 = vld [vmem:[%s2925_s0 + $0x40] sm:$0xff]  ;;  %v58_v17 = vld [vmem:[%s2925_s0 + $0xb0] sm:$0xff] }
  0x19   :  { %2217 = vmatprep.mubr.msk.f32.mxu1 %vm70_vm0, %v54_v8  ;;  %v2285_v16 = vld [vmem:[%s2927_s2] sm:$0xff]   ;;  %v2286_v18 = vld [vmem:[%s2927_s2 + $0x8] sm:$0xff]   ;;  %v59_v20 = vld [vmem:[%s2925_s0 + $0xb8] sm:$0xff]  ;;  %p2486_p11 = por %p2485_p10, %p2484_p9 }
  0x1a   :  { %2194 = vmatmul.mubr.msk.f32.gmra.mrb[2].mxu0 %vm70_vm0, %v39_v4  ;;  %2238 = vmatprep.subr.bf16.mxu1 %v2285_v16  ;;  %v45_v19 = vld [vmem:[%s2925_s0 + $0x48] sm:$0xff]  ;;  %v46_v21 = vld [vmem:[%s2925_s0 + $0x50] sm:$0xff]  ;;  %v60_v22 = vld [vmem:[%s2925_s0 + $0xc0] sm:$0xff] }
  0x1b   :  { %2196 = vmatprep.mubr.msk.f32.mxu0 %vm70_vm0, %v40_v5  ;;  %2239 = vmatpush3.bf16.msra.mxu1 %v2285_v16  ;;  %v2287_v23 = vld [vmem:[%s2927_s2 + $0x10] sm:$0xff]   ;;  %v47_v24 = vld [vmem:[%s2925_s0 + $0x58] sm:$0xff]  ;;  %v61_v25 = vld [vmem:[%s2925_s0 + $0xc8] sm:$0xff]  ;;  %p2487_p12 = pnand %p2486_p11, %p2480_p8 }
  0x1c   :  { %2218 = vmatmul.mubr.msk.f32.gmra.mrb[2].mxu1 %vm70_vm0, %v55_v10  ;;  %2240 = vmatprep.subr.bf16.mxu1 %v2286_v18  ;;  %v48_v26 = vld [vmem:[%s2925_s0 + $0x60] sm:$0xff]  ;;  %v62_v27 = vld [vmem:[%s2925_s0 + $0xd0] sm:$0xff]  ;;  %v49_v28 = vld [vmem:[%s2925_s0 + $0x68] sm:$0xff] }
  0x1d   :  { %2220 = vmatprep.mubr.msk.f32.mxu1 %vm70_vm0, %v56_v12  ;;  %v63_v29 = vld [vmem:[%s2925_s0 + $0xd8] sm:$0xff]  ;;  %v50_v30 = vld [vmem:[%s2925_s0 + $0x70] sm:$0xff]  ;;  %v64_v31 = vld [vmem:[%s2925_s0 + $0xe0] sm:$0xff] }
  0x1e   :  { %2197 = vmatmul.mubr.msk.f32.gmra.mrb[4].mxu0 %vm70_vm0, %v41_v9  ;;  %v51_v32 = vld [vmem:[%s2925_s0 + $0x78] sm:$0xff]  ;;  %v65_v33 = vld [vmem:[%s2925_s0 + $0xe8] sm:$0xff]  ;;  %v66_v34 = vld [vmem:[%s2925_s0 + $0xf0] sm:$0xff] }
  0x1f   :  { %2199 = vmatprep.mubr.msk.f32.mxu0 %vm70_vm0, %v42_v11  ;;  %2241 = vmatpush3.bf16.msra.mxu1 %v2286_v18  ;;  %v67_v35 = vld [vmem:[%s2925_s0 + $0xf8] sm:$0xff]  ;;  %v2289_v37 = vld [vmem:[#allocation2] ss:$8 sps:$4 sm:$0xff]   ;;  %v2291_v38 = vld [vmem:[#allocation2 + $0x4] ss:$8 sps:$4 sm:$0xff]  }
  0x20   :  { %2221 = vmatmul.mubr.msk.f32.gmra.mrb[4].mxu1 %vm70_vm0, %v57_v14  ;;  %2242 = vmatprep.subr.bf16.mxu1 %v2287_v23  ;;  %v2288_v36 = vld [vmem:[%s2927_s2 + $0x18] sm:$0xff]   ;;  %v2297_v41 = vld [vmem:[#allocation2 + $0x24] ss:$8 sps:$4 sm:$0xff]   ;;  %v2295_v42 = vld [vmem:[#allocation2 + $0x20] ss:$8 sps:$4 sm:$0xff]  }
  0x21   :  { %2223 = vmatprep.mubr.msk.f32.mxu1 %vm70_vm0, %v58_v17  ;;  %v2294_v39 = vld [vmem:[#allocation2 + $0x14] ss:$8 sps:$4 sm:$0xff]   ;;  %840 = vmatprep.subr.bf16.mxu0 %v2291_v38  ;;  %v2292_v40 = vld [vmem:[#allocation2 + $0x10] ss:$8 sps:$4 sm:$0xff]   ;;  %v2303_v45 = vld [vmem:[#allocation2 + $0x44] ss:$8 sps:$4 sm:$0xff]  }
  0x22   :  { %2200 = vmatmul.mubr.msk.f32.gmra.mrb[6].mxu0 %vm70_vm0, %v43_v13  ;;  %v2300_v43 = vld [vmem:[#allocation2 + $0x34] ss:$8 sps:$4 sm:$0xff]   ;;  %v2298_v44 = vld [vmem:[#allocation2 + $0x30] ss:$8 sps:$4 sm:$0xff]   ;;  %v2301_v46 = vld [vmem:[#allocation2 + $0x40] ss:$8 sps:$4 sm:$0xff]  }
  0x23   :  { %2202 = vmatprep.mubr.msk.f32.mxu0 %vm70_vm0, %v44_v15  ;;  %2243 = vmatpush3.bf16.msra.mxu1 %v2287_v23  ;;  %v2306_v47 = vld [vmem:[#allocation2 + $0x54] ss:$8 sps:$4 sm:$0xff]   ;;  %v2304_v48 = vld [vmem:[#allocation2 + $0x50] ss:$8 sps:$4 sm:$0xff]   ;;  %v2698_v49 = vld [vmem:[%s2929_s4] ss:$0 sm:$0xff] }
  0x24   :  { %2224 = vmatmul.mubr.msk.f32.gmra.mrb[6].mxu1 %vm70_vm0, %v59_v20  ;;  %2244 = vmatprep.subr.bf16.mxu1 %v2288_v36  ;;  %vm2063_vm4 = vmpackc.low %vm1190_vm3, %vm1190_vm3 }
  0x25   :  { %2226 = vmatprep.mubr.msk.f32.mxu1 %vm70_vm0, %v60_v22  ;;  %841 = vmatpush1.bf16.msra.mxu0 %v2289_v37 }
  0x26   :  { %2203 = vmatmul.mubr.msk.f32.gmra.mrb[8].mxu0 %vm70_vm0, %v45_v19  ;;  %842 = vmatprep.subr.bf16.mxu0 %v2294_v39 }
  0x27   :  { %2205 = vmatprep.mubr.msk.f32.mxu0 %vm70_vm0, %v46_v21  ;;  %2245 = vmatpush3.bf16.msra.mxu1 %v2288_v36 }
  0x28   :  { %2227 = vmatmul.mubr.msk.f32.gmra.mrb[8].mxu1 %vm70_vm0, %v61_v25 }
  0x29   :  { %2229 = vmatprep.mubr.msk.f32.mxu1 %vm70_vm0, %v62_v27  ;;  %843 = vmatpush1.bf16.msra.mxu0 %v2292_v40 }
  0x2a   :  { %2206 = vmatmul.mubr.msk.f32.gmra.mrb[10].mxu0 %vm70_vm0, %v47_v24  ;;  %844 = vmatprep.subr.bf16.mxu0 %v2297_v41 }
  0x2b   :  { %2208 = vmatprep.mubr.msk.f32.mxu0 %vm70_vm0, %v48_v26 }
  0x2c   :  { %2230 = vmatmul.mubr.msk.f32.gmra.mrb[10].mxu1 %vm70_vm0, %v63_v29 }
  0x2d   :  { %2232 = vmatprep.mubr.msk.f32.mxu1 %vm70_vm0, %v64_v31  ;;  %845 = vmatpush1.bf16.msra.mxu0 %v2295_v42 }
  0x2e   :  { %2209 = vmatmul.mubr.msk.f32.gmra.mrb[12].mxu0 %vm70_vm0, %v49_v28  ;;  %846 = vmatprep.subr.bf16.mxu0 %v2300_v43 }
  0x2f   :  { %2211 = vmatprep.mubr.msk.f32.mxu0 %vm70_vm0, %v50_v30 }
  0x30   :  { %2233 = vmatmul.mubr.msk.f32.gmra.mrb[12].mxu1 %vm70_vm0, %v65_v33 }
  0x31   :  { %2235 = vmatprep.mubr.msk.f32.mxu1 %vm70_vm0, %v66_v34  ;;  %847 = vmatpush1.bf16.msra.mxu0 %v2298_v44 }
  0x32   :  { %2212 = vmatmul.mubr.msk.f32.gmra.mrb[14].mxu0 %vm70_vm0, %v51_v32  ;;  %848 = vmatprep.subr.bf16.mxu0 %v2303_v45 }
  0x34   :  { %2236 = vmatmul.mubr.msk.f32.gmra.mrb[14].mxu1 %vm70_vm0, %v67_v35 }
  0x35   :  { %849 = vmatpush1.bf16.msra.mxu0 %v2301_v46 }
  0x36   :  { %850 = vmatprep.subr.bf16.mxu0 %v2306_v47 }
  0x39   :  { %851 = vmatpush1.bf16.msra.mxu0 %v2304_v48 }
  0xe9   :  { %v2192_v50 = vpop.f32.mrb[0].mxu0 }
  0xea   :  { %v239_v51 = vadd.f32 %v2192_v50, %v2698_v49  ;;  %v233_v52 = vpop.f32.mrb[1].mxu0 }
  0xeb   :  { %v234_v53 = vadd.f32 %v233_v52, %v2698_v49  ;;  %v2216_v57 = vpop.f32.mrb[0].mxu1 }
  0xec   :  { %v393_v54 = vmax.f32 %v239_v51, 0.0  ;;  %v319_v60 = vadd.f32 %v2216_v57, %v2698_v49  ;;  %v313_v61 = vpop.f32.mrb[1].mxu1 }
  0xed   :  { %v392_v55 = vmax.f32 %v234_v53, 0.0  ;;  %v2195_v56 = vpop.f32.mrb[2].mxu0  ;;  %v314_v0 = vadd.f32 %v313_v61, %v2698_v49 }
  0xee   :  { %v249_v58 = vadd.f32 %v2195_v56, %v2698_v49  ;;  %v243_v59 = vpop.f32.mrb[3].mxu0  ;;  %v409_v2 = vmax.f32 %v319_v60, 0.0 }
  0xef   :  { %v424_v62 = vpack.c.bf16 %v393_v54, %v392_v55  ;;  %v244_v63 = vadd.f32 %v243_v59, %v2698_v49  ;;  %v408_v5 = vmax.f32 %v314_v0, 0.0  ;;  %v2219_v6 = vpop.f32.mrb[2].mxu1 }
  0xf0   :  { %v395_v1 = vmax.f32 %v249_v58, 0.0  ;;  %v329_v9 = vadd.f32 %v2219_v6, %v2698_v49  ;;  %v323_v10 = vpop.f32.mrb[3].mxu1 }
  0xf1   :  { %v394_v3 = vmax.f32 %v244_v63, 0.0  ;;  %2246 = vmatprep.mubr.msk.bf16.mxu1 %vm473_vm1, %v424_v62  ;;  %v2198_v4 = vpop.f32.mrb[4].mxu0  ;;  %v2710_v13 = vpack.c.bf16 %v409_v2, %v408_v5  ;;  %v324_v14 = vadd.f32 %v323_v10, %v2698_v49 }
  0xf2   :  { %v259_v7 = vadd.f32 %v2198_v4, %v2698_v49  ;;  %v253_v8 = vpop.f32.mrb[5].mxu0  ;;  %v411_v16 = vmax.f32 %v329_v9, 0.0 }
  0xf3   :  { %v425_v11 = vpack.c.bf16 %v395_v1, %v394_v3  ;;  %v254_v12 = vadd.f32 %v253_v8, %v2698_v49  ;;  %v410_v19 = vmax.f32 %v324_v14, 0.0  ;;  %v2222_v20 = vpop.f32.mrb[4].mxu1 }
  0xf4   :  { %v397_v15 = vmax.f32 %v259_v7, 0.0  ;;  %v339_v23 = vadd.f32 %v2222_v20, %v2698_v49  ;;  %v333_v24 = vpop.f32.mrb[5].mxu1 }
  0xf5   :  { %2247 = vmatmul.mubr.msk.bf16.vlgmr.msra.gmra.mrb[16].mxu1 %vm473_vm1, %v425_v11  ;;  %v396_v17 = vmax.f32 %v254_v12, 0.0  ;;  %v2201_v18 = vpop.f32.mrb[6].mxu0  ;;  %v2717_v27 = vpack.c.bf16 %v411_v16, %v410_v19  ;;  %v334_v28 = vadd.f32 %v333_v24, %v2698_v49 }
  0xf6   :  { %v269_v21 = vadd.f32 %v2201_v18, %v2698_v49  ;;  %v263_v22 = vpop.f32.mrb[7].mxu0  ;;  %v413_v30 = vmax.f32 %v339_v23, 0.0 }
  0xf7   :  { %v426_v25 = vpack.c.bf16 %v397_v15, %v396_v17  ;;  %v264_v26 = vadd.f32 %v263_v22, %v2698_v49  ;;  %v412_v33 = vmax.f32 %v334_v28, 0.0  ;;  %v2225_v34 = vpop.f32.mrb[6].mxu1 }
  0xf8   :  { %v399_v29 = vmax.f32 %v269_v21, 0.0  ;;  %v349_v37 = vadd.f32 %v2225_v34, %v2698_v49  ;;  %v343_v38 = vpop.f32.mrb[7].mxu1 }
  0xf9   :  { %v398_v31 = vmax.f32 %v264_v26, 0.0  ;;  %2250 = vmatprep.mubr.msk.bf16.mxu1 %vm473_vm1, %v426_v25  ;;  %v2204_v32 = vpop.f32.mrb[8].mxu0  ;;  %v2724_v41 = vpack.c.bf16 %v413_v30, %v412_v33  ;;  %v344_v42 = vadd.f32 %v343_v38, %v2698_v49  ;;  %v2310_v38 = vld [vmem:[#allocation2 + $0x70] ss:$8 sps:$4 sm:$0xff]  }
  0xfa   :  { %v279_v35 = vadd.f32 %v2204_v32, %v2698_v49  ;;  %v273_v36 = vpop.f32.mrb[9].mxu0  ;;  %v415_v44 = vmax.f32 %v349_v37, 0.0  ;;  %v2307_v37 = vld [vmem:[#allocation2 + $0x60] ss:$8 sps:$4 sm:$0xff]  }
  0xfb   :  { %v427_v39 = vpack.c.bf16 %v399_v29, %v398_v31  ;;  %v274_v40 = vadd.f32 %v273_v36, %v2698_v49  ;;  %v414_v47 = vmax.f32 %v344_v42, 0.0  ;;  %v2228_v48 = vpop.f32.mrb[8].mxu1 }
  0xfc   :  { %v401_v43 = vmax.f32 %v279_v35, 0.0  ;;  %v359_v52 = vadd.f32 %v2228_v48, %v2698_v49  ;;  %v353_v53 = vpop.f32.mrb[9].mxu1 }
  0xfd   :  { %2251 = vmatmul.mubr.msk.bf16.gmra.mrb[20].mxu1 %vm473_vm1, %v427_v39  ;;  %v400_v45 = vmax.f32 %v274_v40, 0.0  ;;  %v2207_v46 = vpop.f32.mrb[10].mxu0  ;;  %v435_v56 = vpack.c.bf16 %v415_v44, %v414_v47  ;;  %v354_v57 = vadd.f32 %v353_v53, %v2698_v49  ;;  %v2761_v39 = vld [vmem:[%s2929_s4 + $0x1] ss:$0 sm:$0xff] }
  0xfe   :  { %v289_v50 = vadd.f32 %v2207_v46, %v2698_v49  ;;  %v283_v51 = vpop.f32.mrb[11].mxu0  ;;  %v417_v59 = vmax.f32 %v359_v52, 0.0 }
  0xff   :  { %v428_v54 = vpack.c.bf16 %v401_v43, %v400_v45  ;;  %v284_v55 = vadd.f32 %v283_v51, %v2698_v49  ;;  %v416_v62 = vmax.f32 %v354_v57, 0.0  ;;  %v2231_v63 = vpop.f32.mrb[10].mxu1 }
 0x100   :  { %v403_v58 = vmax.f32 %v289_v50, 0.0  ;;  %v369_v2 = vadd.f32 %v2231_v63, %v2698_v49  ;;  %v363_v3 = vpop.f32.mrb[11].mxu1 }
 0x101   :  { %v402_v60 = vmax.f32 %v284_v55, 0.0  ;;  %2254 = vmatprep.mubr.msk.bf16.mxu1 %vm473_vm1, %v428_v54  ;;  %v2210_v61 = vpop.f32.mrb[12].mxu0  ;;  %v436_v6 = vpack.c.bf16 %v417_v59, %v416_v62  ;;  %v364_v7 = vadd.f32 %v363_v3, %v2698_v49 }
 0x102   :  { %v299_v0 = vadd.f32 %v2210_v61, %v2698_v49  ;;  %v293_v1 = vpop.f32.mrb[13].mxu0  ;;  %v419_v9 = vmax.f32 %v369_v2, 0.0 }
 0x103   :  { %v429_v4 = vpack.c.bf16 %v403_v58, %v402_v60  ;;  %v294_v5 = vadd.f32 %v293_v1, %v2698_v49  ;;  %v418_v12 = vmax.f32 %v364_v7, 0.0  ;;  %v2234_v14 = vpop.f32.mrb[12].mxu1 }
 0x104   :  { %v405_v8 = vmax.f32 %v299_v0, 0.0  ;;  %v379_v17 = vadd.f32 %v2234_v14, %v2698_v49  ;;  %v373_v18 = vpop.f32.mrb[13].mxu1 }
 0x105   :  { %2255 = vmatmul.mubr.msk.bf16.gmra.mrb[24].mxu1 %vm473_vm1, %v429_v4  ;;  %v404_v10 = vmax.f32 %v294_v5, 0.0  ;;  %v2213_v11 = vpop.f32.mrb[14].mxu0  ;;  %v437_v21 = vpack.c.bf16 %v419_v9, %v418_v12  ;;  %v374_v22 = vadd.f32 %v373_v18, %v2698_v49 }
 0x106   :  { %v309_v15 = vadd.f32 %v2213_v11, %v2698_v49  ;;  %v303_v16 = vpop.f32.mrb[15].mxu0  ;;  %v421_v24 = vmax.f32 %v379_v17, 0.0 }
 0x107   :  { %v430_v19 = vpack.c.bf16 %v405_v8, %v404_v10  ;;  %v304_v20 = vadd.f32 %v303_v16, %v2698_v49  ;;  %v420_v26 = vmax.f32 %v374_v22, 0.0  ;;  %v2237_v28 = vpop.f32.mrb[14].mxu1 }
 0x108   :  { %v407_v23 = vmax.f32 %v309_v15, 0.0  ;;  %v389_v29 = vadd.f32 %v2237_v28, %v2698_v49  ;;  %v383_v30 = vpop.f32.mrb[15].mxu1 }
 0x109   :  { %v406_v25 = vmax.f32 %v304_v20, 0.0  ;;  %2258 = vmatprep.mubr.msk.bf16.mxu1 %vm473_vm1, %v430_v19  ;;  %v438_v32 = vpack.c.bf16 %v421_v24, %v420_v26  ;;  %v384_v33 = vadd.f32 %v383_v30, %v2698_v49  ;;  %v2309_v49 = vld [vmem:[#allocation2 + $0x64] ss:$8 sps:$4 sm:$0xff]  }
 0x10a   :  { %v423_v34 = vmax.f32 %v389_v29, 0.0  ;;  %852 = vmatprep.subr.bf16.mxu0 %v2309_v49 }
 0x10b   :  { %v431_v31 = vpack.c.bf16 %v407_v23, %v406_v25  ;;  %v422_v35 = vmax.f32 %v384_v33, 0.0  ;;  %853 = vmatpush1.bf16.msra.mxu0 %v2307_v37 }
 0x10d   :  { %2259 = vmatmul.mubr.msk.bf16.gmra.mrb[28].mxu1 %vm473_vm1, %v431_v31  ;;  %v439_v36 = vpack.c.bf16 %v423_v34, %v422_v35 }
 0x10e   :  { %2262 = vmatprep.mubr.msk.bf16.mxu1 %vm473_vm1, %v2710_v13  ;;  %v2312_v13 = vld [vmem:[#allocation2 + $0x74] ss:$8 sps:$4 sm:$0xff]  }
 0x10f   :  { %854 = vmatprep.subr.bf16.mxu0 %v2312_v13 }
 0x110   :  { %855 = vmatpush1.bf16.msra.mxu0 %v2310_v38 }
 0x115   :  { %2263 = vmatmul.mubr.msk.bf16.gmra.mrb[32].mxu1 %vm473_vm1, %v2717_v27  ;;  %v2508_v27 = vmov 0  }
 0x116   :  { %2266 = vmatprep.mubr.msk.bf16.mxu1 %vm473_vm1, %v2724_v41  ;;  %872 = vmatprep.mubr.bf16.mxu0 %v2508_v27 }
 0x11d   :  { %2267 = vmatmul.mubr.msk.bf16.gmra.mrb[36].mxu1 %vm473_vm1, %v435_v56 }
 0x11e   :  { %2270 = vmatprep.mubr.msk.bf16.mxu1 %vm473_vm1, %v436_v6 }
 0x125   :  { %2271 = vmatmul.mubr.msk.bf16.gmra.mrb[40].mxu1 %vm473_vm1, %v437_v21 }
 0x126   :  { %2274 = vmatprep.mubr.msk.bf16.mxu1 %vm473_vm1, %v438_v32 }
 0x12d   :  { %2275 = vmatmul.mubr.msk.bf16.gmra.mrb[44].mxu1 %vm473_vm1, %v439_v36 }
 0x1c8   :  { %v2248_v40 = vpop.f32.mrb[16].mxu1 }
 0x1c9   :  { %v565_v41 = vadd.f32 %v2248_v40, %v2761_v39  ;;  %v556_v42 = vpop.f32.mrb[17].mxu1 }
 0x1ca   :  { %v557_v43 = vadd.f32 %v556_v42, %v2761_v39  ;;  %v2249_v44 = vpop.f32.mrb[18].mxu1 }
 0x1cb   :  { %v568_v45 = vadd.f32 %v2249_v44, %v2761_v39  ;;  %v559_v46 = vpop.f32.mrb[19].mxu1  ;;  %v685_v48 = vmax.f32 %v565_v41, 0.0 }
 0x1cc   :  { %v560_v47 = vadd.f32 %v559_v46, %v2761_v39  ;;  %v683_v51 = vmax.f32 %v557_v43, 0.0 }
 0x1cd   :  { %v686_v50 = vmax.f32 %v568_v45, 0.0 }
 0x1ce   :  { %v684_v52 = vmax.f32 %v560_v47, 0.0 }
 0x1cf   :  { %v716_v53 = vpack.c.bf16 %v686_v50, %v685_v48 }
 0x1d0   :  { %v715_v54 = vpack.c.bf16 %v684_v52, %v683_v51  ;;  %v2252_v55 = vpop.f32.mrb[20].mxu1 }
 0x1d1   :  { %v581_v56 = vadd.f32 %v2252_v55, %v2761_v39  ;;  %v572_v57 = vpop.f32.mrb[21].mxu1 }
 0x1d2   :  { %873 = vmatmul.mubr.bf16.vlgmr.msra.gmra.mrb[16].mxu0 %v715_v54  ;;  %v573_v58 = vadd.f32 %v572_v57, %v2761_v39  ;;  %v2253_v59 = vpop.f32.mrb[22].mxu1 }
 0x1d3   :  { %v689_v60 = vmax.f32 %v581_v56, 0.0  ;;  %v584_v61 = vadd.f32 %v2253_v59, %v2761_v39  ;;  %v575_v62 = vpop.f32.mrb[23].mxu1  ;;  %882 = vmatprep.mubr.bf16.mxu0 %v2508_v27 }
 0x1d4   :  { %v687_v63 = vmax.f32 %v573_v58, 0.0  ;;  %v576_v0 = vadd.f32 %v575_v62, %v2761_v39 }
 0x1d5   :  { %v690_v1 = vmax.f32 %v584_v61, 0.0 }
 0x1d6   :  { %v688_v2 = vmax.f32 %v576_v0, 0.0 }
 0x1d7   :  { %v718_v3 = vpack.c.bf16 %v690_v1, %v689_v60 }
 0x1d8   :  { %v717_v4 = vpack.c.bf16 %v688_v2, %v687_v63  ;;  %v2256_v5 = vpop.f32.mrb[24].mxu1 }
 0x1d9   :  { %v597_v6 = vadd.f32 %v2256_v5, %v2761_v39  ;;  %v588_v7 = vpop.f32.mrb[25].mxu1 }
 0x1da   :  { %883 = vmatmul.mubr.bf16.gmra.mrb[20].mxu0 %v716_v53  ;;  %v589_v8 = vadd.f32 %v588_v7, %v2761_v39  ;;  %v2257_v9 = vpop.f32.mrb[26].mxu1 }
 0x1db   :  { %892 = vmatprep.mubr.bf16.mxu0 %v2508_v27  ;;  %v693_v10 = vmax.f32 %v597_v6, 0.0  ;;  %v600_v11 = vadd.f32 %v2257_v9, %v2761_v39  ;;  %v591_v12 = vpop.f32.mrb[27].mxu1 }
 0x1dc   :  { %v691_v14 = vmax.f32 %v589_v8, 0.0  ;;  %v592_v15 = vadd.f32 %v591_v12, %v2761_v39 }
 0x1dd   :  { %v694_v16 = vmax.f32 %v600_v11, 0.0 }
 0x1de   :  { %v692_v17 = vmax.f32 %v592_v15, 0.0 }
 0x1df   :  { %v720_v18 = vpack.c.bf16 %v694_v16, %v693_v10 }
 0x1e0   :  { %v719_v19 = vpack.c.bf16 %v692_v17, %v691_v14  ;;  %v2260_v20 = vpop.f32.mrb[28].mxu1 }
 0x1e1   :  { %v613_v21 = vadd.f32 %v2260_v20, %v2761_v39  ;;  %v604_v22 = vpop.f32.mrb[29].mxu1 }
 0x1e2   :  { %893 = vmatmul.mubr.bf16.gmra.mrb[24].mxu0 %v717_v4  ;;  %v605_v23 = vadd.f32 %v604_v22, %v2761_v39  ;;  %v2261_v24 = vpop.f32.mrb[30].mxu1 }
 0x1e3   :  { %902 = vmatprep.mubr.bf16.mxu0 %v2508_v27  ;;  %v697_v25 = vmax.f32 %v613_v21, 0.0  ;;  %v616_v26 = vadd.f32 %v2261_v24, %v2761_v39  ;;  %v607_v28 = vpop.f32.mrb[31].mxu1 }
 0x1e4   :  { %v695_v29 = vmax.f32 %v605_v23, 0.0  ;;  %v608_v30 = vadd.f32 %v607_v28, %v2761_v39 }
 0x1e5   :  { %v698_v31 = vmax.f32 %v616_v26, 0.0 }
 0x1e6   :  { %v696_v32 = vmax.f32 %v608_v30, 0.0  ;;  %v2318_v30 = vld [vmem:[#allocation2 + $0x114] ss:$8 sps:$4 sm:$0xff]  }
 0x1e7   :  { %v2782_v33 = vpack.c.bf16 %v698_v31, %v697_v25  ;;  %v2316_v31 = vld [vmem:[#allocation2 + $0x110] ss:$8 sps:$4 sm:$0xff]  }
 0x1e8   :  { %v721_v34 = vpack.c.bf16 %v696_v32, %v695_v29  ;;  %v2264_v35 = vpop.f32.mrb[32].mxu1  ;;  %v2313_v29 = vld [vmem:[#allocation2 + $0x100] ss:$8 sps:$4 sm:$0xff]   ;;  %v2321_v32 = vld [vmem:[#allocation2 + $0x124] ss:$8 sps:$4 sm:$0xff]  }
 0x1e9   :  { %v629_v36 = vadd.f32 %v2264_v35, %v2761_v39  ;;  %v620_v49 = vpop.f32.mrb[33].mxu1  ;;  %v2322_v35 = vld [vmem:[#allocation2 + $0x130] ss:$8 sps:$4 sm:$0xff]  }
 0x1ea   :  { %903 = vmatmul.mubr.bf16.gmra.mrb[28].mxu0 %v718_v3  ;;  %v621_v37 = vadd.f32 %v620_v49, %v2761_v39  ;;  %v2265_v13 = vpop.f32.mrb[34].mxu1  ;;  %v2325_v49 = vld [vmem:[#allocation2 + $0x140] ss:$8 sps:$4 sm:$0xff]  }
 0x1eb   :  { %912 = vmatprep.mubr.bf16.mxu0 %v2508_v27  ;;  %v701_v38 = vmax.f32 %v629_v36, 0.0  ;;  %v632_v40 = vadd.f32 %v2265_v13, %v2761_v39  ;;  %v623_v41 = vpop.f32.mrb[35].mxu1  ;;  %v2327_v36 = vld [vmem:[#allocation2 + $0x144] ss:$8 sps:$4 sm:$0xff]  }
 0x1ec   :  { %v699_v42 = vmax.f32 %v621_v37, 0.0  ;;  %v624_v43 = vadd.f32 %v623_v41, %v2761_v39  ;;  %v2328_v37 = vld [vmem:[#allocation2 + $0x150] ss:$8 sps:$4 sm:$0xff]   ;;  %v2333_v13 = vld [vmem:[#allocation2 + $0x164] ss:$8 sps:$4 sm:$0xff]  }
 0x1ed   :  { %v702_v44 = vmax.f32 %v632_v40, 0.0  ;;  %v2336_v40 = vld [vmem:[#allocation2 + $0x174] ss:$8 sps:$4 sm:$0xff]   ;;  %v2334_v41 = vld [vmem:[#allocation2 + $0x170] ss:$8 sps:$4 sm:$0xff]  }
 0x1ee   :  { %v700_v45 = vmax.f32 %v624_v43, 0.0  ;;  %v750_v43 = vlaneseq }
 0x1ef   :  { %v724_v46 = vpack.c.bf16 %v702_v44, %v701_v38  ;;  %v2331_v38 = vld [vmem:[#allocation2 + $0x160] ss:$8 sps:$4 sm:$0xff]  }
 0x1f0   :  { %v723_v47 = vpack.c.bf16 %v700_v45, %v699_v42  ;;  %v2268_v48 = vpop.f32.mrb[36].mxu1  ;;  %v2339_v42 = vld [vmem:[#allocation2 + $0x184] ss:$8 sps:$4 sm:$0xff]   ;;  %v2337_v44 = vld [vmem:[#allocation2 + $0x180] ss:$8 sps:$4 sm:$0xff]  }
 0x1f1   :  { %v645_v50 = vadd.f32 %v2268_v48, %v2761_v39  ;;  %v636_v51 = vpop.f32.mrb[37].mxu1  ;;  %v2342_v45 = vld [vmem:[#allocation2 + $0x194] ss:$8 sps:$4 sm:$0xff]   ;;  %v2345_v48 = vld [vmem:[#allocation2 + $0x1a4] ss:$8 sps:$4 sm:$0xff]  }
 0x1f2   :  { %913 = vmatmul.mubr.bf16.gmra.mrb[32].mxu0 %v719_v19  ;;  %v637_v52 = vadd.f32 %v636_v51, %v2761_v39  ;;  %v2269_v53 = vpop.f32.mrb[38].mxu1  ;;  %v2343_v51 = vld [vmem:[#allocation2 + $0x1a0] ss:$8 sps:$4 sm:$0xff]  }
 0x1f3   :  { %922 = vmatprep.mubr.bf16.mxu0 %v2508_v27  ;;  %v705_v54 = vmax.f32 %v645_v50, 0.0  ;;  %v648_v55 = vadd.f32 %v2269_v53, %v2761_v39  ;;  %v639_v56 = vpop.f32.mrb[39].mxu1 }
 0x1f4   :  { %v703_v57 = vmax.f32 %v637_v52, 0.0  ;;  %v640_v58 = vadd.f32 %v639_v56, %v2761_v39  ;;  %v2013_v52 = vld [vmem:[%s2929_s4 + $0x2] ss:$8 sm:$0x3]  ;;  %v2346_v56 = vld [vmem:[#allocation2 + $0x1b0] ss:$8 sps:$4 sm:$0xff]  }
 0x1f5   :  { %v706_v59 = vmax.f32 %v648_v55, 0.0 }
 0x1f6   :  { %v704_v60 = vmax.f32 %v640_v58, 0.0 }
 0x1f7   :  { %v726_v61 = vpack.c.bf16 %v706_v59, %v705_v54  ;;  %v2348_v54 = vld [vmem:[#allocation2 + $0x1b4] ss:$8 sps:$4 sm:$0xff]   ;;  %v2351_v59 = vld [vmem:[#allocation2 + $0x1c4] ss:$8 sps:$4 sm:$0xff]  }
 0x1f8   :  { %v725_v62 = vpack.c.bf16 %v704_v60, %v703_v57  ;;  %v2272_v63 = vpop.f32.mrb[40].mxu1 }
 0x1f9   :  { %v661_v0 = vadd.f32 %v2272_v63, %v2761_v39  ;;  %v652_v1 = vpop.f32.mrb[41].mxu1 }
 0x1fa   :  { %923 = vmatmul.mubr.bf16.gmra.mrb[36].mxu0 %v720_v18  ;;  %v653_v2 = vadd.f32 %v652_v1, %v2761_v39  ;;  %v2273_v3 = vpop.f32.mrb[42].mxu1 }
 0x1fb   :  { %932 = vmatprep.mubr.bf16.mxu0 %v2508_v27  ;;  %v709_v4 = vmax.f32 %v661_v0, 0.0  ;;  %v664_v5 = vadd.f32 %v2273_v3, %v2761_v39  ;;  %v655_v6 = vpop.f32.mrb[43].mxu1 }
 0x1fc   :  { %v707_v7 = vmax.f32 %v653_v2, 0.0  ;;  %v656_v8 = vadd.f32 %v655_v6, %v2761_v39 }
 0x1fd   :  { %v710_v9 = vmax.f32 %v664_v5, 0.0 }
 0x1fe   :  { %v708_v10 = vmax.f32 %v656_v8, 0.0 }
 0x1ff   :  { %v728_v11 = vpack.c.bf16 %v710_v9, %v709_v4  ;;  %v2354_v4 = vld [vmem:[#allocation2 + $0x1d4] ss:$8 sps:$4 sm:$0xff]  }
 0x200   :  { %v727_v12 = vpack.c.bf16 %v708_v10, %v707_v7  ;;  %v2276_v14 = vpop.f32.mrb[44].mxu1  ;;  %v2352_v7 = vld [vmem:[#allocation2 + $0x1d0] ss:$8 sps:$4 sm:$0xff]  }
 0x201   :  { %v677_v15 = vadd.f32 %v2276_v14, %v2761_v39  ;;  %v668_v16 = vpop.f32.mrb[45].mxu1  ;;  %v2357_v14 = vld [vmem:[#allocation2 + $0x1e4] ss:$8 sps:$4 sm:$0xff]  }
 0x202   :  { %933 = vmatmul.mubr.bf16.gmra.mrb[40].mxu0 %v721_v34  ;;  %v669_v17 = vadd.f32 %v668_v16, %v2761_v39  ;;  %v2277_v18 = vpop.f32.mrb[46].mxu1  ;;  %v2324_v34 = vld [vmem:[#allocation2 + $0x134] ss:$8 sps:$4 sm:$0xff]  }
 0x203   :  { %942 = vmatprep.mubr.bf16.mxu0 %v2508_v27  ;;  %v713_v19 = vmax.f32 %v677_v15, 0.0  ;;  %v680_v20 = vadd.f32 %v2277_v18, %v2761_v39  ;;  %v671_v21 = vpop.f32.mrb[47].mxu1 }
 0x204   :  { %v711_v22 = vmax.f32 %v669_v17, 0.0  ;;  %v672_v23 = vadd.f32 %v671_v21, %v2761_v39  ;;  %v2315_v39 = vld [vmem:[#allocation2 + $0x104] ss:$8 sps:$4 sm:$0xff]   ;;  %v2355_v17 = vld [vmem:[#allocation2 + $0x1e0] ss:$8 sps:$4 sm:$0xff]  }
 0x205   :  { %v714_v24 = vmax.f32 %v680_v20, 0.0  ;;  %1401 = vmatprep.subr.bf16.mxu1 %v2315_v39 }
 0x206   :  { %v712_v25 = vmax.f32 %v672_v23, 0.0  ;;  %1402 = vmatpush1.bf16.msra.mxu1 %v2313_v29 }
 0x207   :  { %v730_v26 = vpack.c.bf16 %v714_v24, %v713_v19  ;;  %1403 = vmatprep.subr.bf16.mxu1 %v2318_v30 }
 0x208   :  { %v729_v28 = vpack.c.bf16 %v712_v25, %v711_v22  ;;  %v2358_v25 = vld [vmem:[#allocation2 + $0x1f0] ss:$8 sps:$4 sm:$0xff]  }
 0x20a   :  { %943 = vmatmul.mubr.bf16.gmra.mrb[44].mxu0 %v2782_v33  ;;  %1404 = vmatpush1.bf16.msra.mxu1 %v2316_v31  ;;  %v2319_v33 = vld [vmem:[#allocation2 + $0x120] ss:$8 sps:$4 sm:$0xff]  }
 0x20b   :  { %952 = vmatprep.mubr.bf16.mxu0 %v2508_v27  ;;  %1405 = vmatprep.subr.bf16.mxu1 %v2321_v32 }
 0x20e   :  { %1406 = vmatpush1.bf16.msra.mxu1 %v2319_v33 }
 0x20f   :  { %1407 = vmatprep.subr.bf16.mxu1 %v2324_v34 }
 0x212   :  { %953 = vmatmul.mubr.bf16.gmra.mrb[48].mxu0 %v723_v47  ;;  %1408 = vmatpush1.bf16.msra.mxu1 %v2322_v35  ;;  %v2340_v47 = vld [vmem:[#allocation2 + $0x190] ss:$8 sps:$4 sm:$0xff]  }
 0x213   :  { %962 = vmatprep.mubr.bf16.mxu0 %v2508_v27  ;;  %1409 = vmatprep.subr.bf16.mxu1 %v2327_v36 }
 0x216   :  { %1410 = vmatpush1.bf16.msra.mxu1 %v2325_v49 }
 0x21a   :  { %963 = vmatmul.mubr.bf16.gmra.mrb[52].mxu0 %v724_v46  ;;  %v751_v46 = vshrl.u32 %v750_v43, 7 }
 0x21b   :  { %972 = vmatprep.mubr.bf16.mxu0 %v2508_v27 }
 0x21c   :  { %v2813_v50 = vsub.s32 0, %v751_v46  ;;  %v2818_v53 = vsub.s32 1, %v751_v46 }
 0x21e   :  { %v2821_v55 = vrot.slane %v2013_v52, %v2813_v50  ;;  %v2824_v57 = vrot.slane %v2013_v52, %v2818_v53 }
 0x222   :  { %973 = vmatmul.mubr.bf16.gmra.mrb[56].mxu0 %v725_v62  ;;  %v2349_v62 = vld [vmem:[#allocation2 + $0x1c0] ss:$8 sps:$4 sm:$0xff]  }
 0x223   :  { %982 = vmatprep.mubr.bf16.mxu0 %v2508_v27 }
 0x22a   :  { %983 = vmatmul.mubr.bf16.gmra.mrb[60].mxu0 %v726_v61 }
 0x22b   :  { %992 = vmatprep.mubr.bf16.mxu0 %v2508_v27 }
 0x232   :  { %993 = vmatmul.mubr.bf16.gmra.mrb[64].mxu0 %v727_v12 }
 0x233   :  { %1002 = vmatprep.mubr.bf16.mxu0 %v2508_v27 }
 0x23a   :  { %1003 = vmatmul.mubr.bf16.gmra.mrb[68].mxu0 %v728_v11 }
 0x23b   :  { %1012 = vmatprep.mubr.bf16.mxu0 %v2508_v27 }
 0x242   :  { %1013 = vmatmul.mubr.bf16.gmra.mrb[72].mxu0 %v729_v28 }
 0x243   :  { %1022 = vmatprep.mubr.bf16.mxu0 %v2508_v27  ;;  %v2330_v27 = vld [vmem:[#allocation2 + $0x154] ss:$8 sps:$4 sm:$0xff]  }
 0x244   :  { %1411 = vmatprep.subr.bf16.mxu1 %v2330_v27  ;;  %v2363_v27 = vld [vmem:[#allocation2 + $0x204] ss:$8 sps:$4 sm:$0xff]  }
 0x245   :  { %1412 = vmatpush1.bf16.msra.mxu1 %v2328_v37 }
 0x246   :  { %1413 = vmatprep.subr.bf16.mxu1 %v2333_v13 }
 0x249   :  { %1414 = vmatpush1.bf16.msra.mxu1 %v2331_v38 }
 0x24a   :  { %1023 = vmatmul.mubr.bf16.gmra.mrb[76].mxu0 %v730_v26  ;;  %1415 = vmatprep.subr.bf16.mxu1 %v2336_v40  ;;  %v2360_v26 = vld [vmem:[#allocation2 + $0x1f4] ss:$8 sps:$4 sm:$0xff]  }
 0x24d   :  { %1416 = vmatpush1.bf16.msra.mxu1 %v2334_v41 }
 0x24e   :  { %1417 = vmatprep.subr.bf16.mxu1 %v2339_v42 }
 0x251   :  { %1418 = vmatpush1.bf16.msra.mxu1 %v2337_v44 }
 0x252   :  { %1419 = vmatprep.subr.bf16.mxu1 %v2342_v45 }
 0x255   :  { %1420 = vmatpush1.bf16.msra.mxu1 %v2340_v47 }
 0x256   :  { %1421 = vmatprep.subr.bf16.mxu1 %v2345_v48 }
 0x259   :  { %1422 = vmatpush1.bf16.msra.mxu1 %v2343_v51 }
 0x25a   :  { %1423 = vmatprep.subr.bf16.mxu1 %v2348_v54 }
 0x25d   :  { %1424 = vmatpush1.bf16.msra.mxu1 %v2346_v56 }
 0x25e   :  { %1425 = vmatprep.subr.bf16.mxu1 %v2351_v59 }
 0x261   :  { %1426 = vmatpush1.bf16.msra.mxu1 %v2349_v62 }
 0x262   :  { %1427 = vmatprep.subr.bf16.mxu1 %v2354_v4 }
 0x265   :  { %1428 = vmatpush1.bf16.msra.mxu1 %v2352_v7 }
 0x266   :  { %1429 = vmatprep.subr.bf16.mxu1 %v2357_v14 }
 0x269   :  { %1430 = vmatpush1.bf16.msra.mxu1 %v2355_v17 }
 0x26a   :  { %1431 = vmatprep.subr.bf16.mxu1 %v2360_v26 }
 0x26d   :  { %1432 = vmatpush1.bf16.msra.mxu1 %v2358_v25 }
 0x26e   :  { %1652 = vmatprep.subr.bf16.mxu1 %v2363_v27 }
 0x2a5   :  { %v874_v58 = vpop.f32.mrb[16].mxu0 }
 0x2a6   :  { %v875_v60 = vadd.f32 %v874_v58, %v2821_v55  ;;  %v876_v61 = vpop.f32.mrb[17].mxu0 }
 0x2a7   :  { %v877_v63 = vadd.f32 %v876_v61, %v2824_v57  ;;  %v878_v0 = vpop.f32.mrb[18].mxu0 }
 0x2a8   :  { %v879_v1 = vadd.f32 %v878_v0, %v2821_v55  ;;  %v880_v2 = vpop.f32.mrb[19].mxu0  ;;  %v1033_v5 = vmax.f32 %v875_v60, 0.0 }
 0x2a9   :  { %v881_v3 = vadd.f32 %v880_v2, %v2824_v57  ;;  %v1034_v8 = vmax.f32 %v877_v63, 0.0 }
 0x2aa   :  { %v1035_v6 = vmax.f32 %v879_v1, 0.0 }
 0x2ab   :  { %v1036_v9 = vmax.f32 %v881_v3, 0.0 }
 0x2ac   :  { %v1097_v10 = vmax.f32 %v1033_v5, %v1035_v6 }
 0x2ad   :  { %v1118_v11 = vmax.f32 %v1034_v8, %v1036_v9  ;;  %v884_v12 = vpop.f32.mrb[20].mxu0 }
 0x2ae   :  { %v885_v15 = vadd.f32 %v884_v12, %v2821_v55  ;;  %v886_v16 = vpop.f32.mrb[21].mxu0 }
 0x2af   :  { %v887_v18 = vadd.f32 %v886_v16, %v2824_v57  ;;  %v888_v19 = vpop.f32.mrb[22].mxu0 }
 0x2b0   :  { %v1037_v20 = vmax.f32 %v885_v15, 0.0  ;;  %v889_v21 = vadd.f32 %v888_v19, %v2821_v55  ;;  %v890_v22 = vpop.f32.mrb[23].mxu0 }
 0x2b1   :  { %v1038_v23 = vmax.f32 %v887_v18, 0.0  ;;  %v891_v24 = vadd.f32 %v890_v22, %v2824_v57 }
 0x2b2   :  { %v1098_v28 = vmax.f32 %v1097_v10, %v1037_v20  ;;  %v1039_v39 = vmax.f32 %v889_v21, 0.0 }
 0x2b3   :  { %v1119_v29 = vmax.f32 %v1118_v11, %v1038_v23  ;;  %v1040_v30 = vmax.f32 %v891_v24, 0.0 }
 0x2b4   :  { %v1099_v31 = vmax.f32 %v1098_v28, %v1039_v39 }
 0x2b5   :  { %v1120_v32 = vmax.f32 %v1119_v29, %v1040_v30  ;;  %v894_v33 = vpop.f32.mrb[24].mxu0 }
 0x2b6   :  { %v895_v34 = vadd.f32 %v894_v33, %v2821_v55  ;;  %v896_v35 = vpop.f32.mrb[25].mxu0 }
 0x2b7   :  { %v897_v36 = vadd.f32 %v896_v35, %v2824_v57  ;;  %v898_v49 = vpop.f32.mrb[26].mxu0 }
 0x2b8   :  { %v1041_v37 = vmax.f32 %v895_v34, 0.0  ;;  %v899_v13 = vadd.f32 %v898_v49, %v2821_v55  ;;  %v900_v38 = vpop.f32.mrb[27].mxu0 }
 0x2b9   :  { %v1042_v40 = vmax.f32 %v897_v36, 0.0  ;;  %v901_v41 = vadd.f32 %v900_v38, %v2824_v57 }
 0x2ba   :  { %v1100_v42 = vmax.f32 %v1099_v31, %v1041_v37  ;;  %v1043_v43 = vmax.f32 %v899_v13, 0.0 }
 0x2bb   :  { %v1121_v44 = vmax.f32 %v1120_v32, %v1042_v40  ;;  %v1044_v45 = vmax.f32 %v901_v41, 0.0 }
 0x2bc   :  { %v1101_v46 = vmax.f32 %v1100_v42, %v1043_v43 }
 0x2bd   :  { %v1122_v47 = vmax.f32 %v1121_v44, %v1044_v45  ;;  %v904_v48 = vpop.f32.mrb[28].mxu0 }
 0x2be   :  { %v905_v51 = vadd.f32 %v904_v48, %v2821_v55  ;;  %v906_v52 = vpop.f32.mrb[29].mxu0 }
 0x2bf   :  { %v907_v54 = vadd.f32 %v906_v52, %v2824_v57  ;;  %v908_v56 = vpop.f32.mrb[30].mxu0 }
 0x2c0   :  { %v1045_v58 = vmax.f32 %v905_v51, 0.0  ;;  %v909_v59 = vadd.f32 %v908_v56, %v2821_v55  ;;  %v910_v60 = vpop.f32.mrb[31].mxu0 }
 0x2c1   :  { %v1046_v61 = vmax.f32 %v907_v54, 0.0  ;;  %v911_v62 = vadd.f32 %v910_v60, %v2824_v57 }
 0x2c2   :  { %v1102_v63 = vmax.f32 %v1101_v46, %v1045_v58  ;;  %v1047_v0 = vmax.f32 %v909_v59, 0.0 }
 0x2c3   :  { %v1123_v1 = vmax.f32 %v1122_v47, %v1046_v61  ;;  %v1048_v2 = vmax.f32 %v911_v62, 0.0 }
 0x2c4   :  { %v1103_v3 = vmax.f32 %v1102_v63, %v1047_v0 }
 0x2c5   :  { %v1124_v4 = vmax.f32 %v1123_v1, %v1048_v2  ;;  %v914_v5 = vpop.f32.mrb[32].mxu0 }
 0x2c6   :  { %v915_v6 = vadd.f32 %v914_v5, %v2821_v55  ;;  %v916_v7 = vpop.f32.mrb[33].mxu0 }
 0x2c7   :  { %v917_v8 = vadd.f32 %v916_v7, %v2824_v57  ;;  %v918_v9 = vpop.f32.mrb[34].mxu0 }
 0x2c8   :  { %v1049_v10 = vmax.f32 %v915_v6, 0.0  ;;  %v919_v11 = vadd.f32 %v918_v9, %v2821_v55  ;;  %v920_v12 = vpop.f32.mrb[35].mxu0 }
 0x2c9   :  { %v1050_v14 = vmax.f32 %v917_v8, 0.0  ;;  %v921_v15 = vadd.f32 %v920_v12, %v2824_v57 }
 0x2ca   :  { %v1104_v16 = vmax.f32 %v1103_v3, %v1049_v10  ;;  %v1051_v17 = vmax.f32 %v919_v11, 0.0 }
 0x2cb   :  { %v1125_v18 = vmax.f32 %v1124_v4, %v1050_v14  ;;  %v1052_v19 = vmax.f32 %v921_v15, 0.0 }
 0x2cc   :  { %v1105_v20 = vmax.f32 %v1104_v16, %v1051_v17 }
 0x2cd   :  { %v1126_v21 = vmax.f32 %v1125_v18, %v1052_v19  ;;  %v924_v22 = vpop.f32.mrb[36].mxu0 }
 0x2ce   :  { %v925_v23 = vadd.f32 %v924_v22, %v2821_v55  ;;  %v926_v24 = vpop.f32.mrb[37].mxu0 }
 0x2cf   :  { %v927_v25 = vadd.f32 %v926_v24, %v2824_v57  ;;  %v928_v26 = vpop.f32.mrb[38].mxu0 }
 0x2d0   :  { %v1053_v28 = vmax.f32 %v925_v23, 0.0  ;;  %v929_v39 = vadd.f32 %v928_v26, %v2821_v55  ;;  %v930_v29 = vpop.f32.mrb[39].mxu0 }
 0x2d1   :  { %v1054_v30 = vmax.f32 %v927_v25, 0.0  ;;  %v931_v31 = vadd.f32 %v930_v29, %v2824_v57 }
 0x2d2   :  { %v1106_v32 = vmax.f32 %v1105_v20, %v1053_v28  ;;  %v1055_v33 = vmax.f32 %v929_v39, 0.0 }
 0x2d3   :  { %v1127_v34 = vmax.f32 %v1126_v21, %v1054_v30  ;;  %v1056_v35 = vmax.f32 %v931_v31, 0.0 }
 0x2d4   :  { %v1107_v36 = vmax.f32 %v1106_v32, %v1055_v33 }
 0x2d5   :  { %v1128_v49 = vmax.f32 %v1127_v34, %v1056_v35  ;;  %v934_v27 = vpop.f32.mrb[40].mxu0 }
 0x2d6   :  { %v935_v37 = vadd.f32 %v934_v27, %v2821_v55  ;;  %v936_v13 = vpop.f32.mrb[41].mxu0 }
 0x2d7   :  { %v937_v38 = vadd.f32 %v936_v13, %v2824_v57  ;;  %v938_v40 = vpop.f32.mrb[42].mxu0 }
 0x2d8   :  { %v1057_v41 = vmax.f32 %v935_v37, 0.0  ;;  %v939_v42 = vadd.f32 %v938_v40, %v2821_v55  ;;  %v940_v43 = vpop.f32.mrb[43].mxu0 }
 0x2d9   :  { %v1058_v44 = vmax.f32 %v937_v38, 0.0  ;;  %v941_v45 = vadd.f32 %v940_v43, %v2824_v57 }
 0x2da   :  { %v1108_v46 = vmax.f32 %v1107_v36, %v1057_v41  ;;  %v1059_v47 = vmax.f32 %v939_v42, 0.0 }
 0x2db   :  { %v1129_v48 = vmax.f32 %v1128_v49, %v1058_v44  ;;  %v1060_v51 = vmax.f32 %v941_v45, 0.0 }
 0x2dc   :  { %v1109_v52 = vmax.f32 %v1108_v46, %v1059_v47 }
 0x2dd   :  { %v1130_v54 = vmax.f32 %v1129_v48, %v1060_v51  ;;  %v944_v56 = vpop.f32.mrb[44].mxu0 }
 0x2de   :  { %v945_v58 = vadd.f32 %v944_v56, %v2821_v55  ;;  %v946_v59 = vpop.f32.mrb[45].mxu0 }
 0x2df   :  { %v947_v60 = vadd.f32 %v946_v59, %v2824_v57  ;;  %v948_v61 = vpop.f32.mrb[46].mxu0 }
 0x2e0   :  { %v1061_v62 = vmax.f32 %v945_v58, 0.0  ;;  %v949_v63 = vadd.f32 %v948_v61, %v2821_v55  ;;  %v950_v0 = vpop.f32.mrb[47].mxu0 }
 0x2e1   :  { %v1062_v1 = vmax.f32 %v947_v60, 0.0  ;;  %v951_v2 = vadd.f32 %v950_v0, %v2824_v57 }
 0x2e2   :  { %v1110_v3 = vmax.f32 %v1109_v52, %v1061_v62  ;;  %v1063_v4 = vmax.f32 %v949_v63, 0.0 }
 0x2e3   :  { %v1131_v5 = vmax.f32 %v1130_v54, %v1062_v1  ;;  %v1064_v6 = vmax.f32 %v951_v2, 0.0 }
 0x2e4   :  { %v2858_v7 = vmax.f32 %v1110_v3, %v1063_v4 }
 0x2e5   :  { %v2860_v8 = vmax.f32 %v1131_v5, %v1064_v6  ;;  %v954_v9 = vpop.f32.mrb[48].mxu0 }
 0x2e6   :  { %v955_v10 = vadd.f32 %v954_v9, %v2821_v55  ;;  %v956_v11 = vpop.f32.mrb[49].mxu0 }
 0x2e7   :  { %v957_v12 = vadd.f32 %v956_v11, %v2824_v57  ;;  %v958_v14 = vpop.f32.mrb[50].mxu0 }
 0x2e8   :  { %v959_v15 = vadd.f32 %v958_v14, %v2821_v55  ;;  %v960_v16 = vpop.f32.mrb[51].mxu0  ;;  %v1065_v18 = vmax.f32 %v955_v10, 0.0 }
 0x2e9   :  { %v961_v17 = vadd.f32 %v960_v16, %v2824_v57  ;;  %v1066_v20 = vmax.f32 %v957_v12, 0.0 }
 0x2ea   :  { %v1067_v19 = vmax.f32 %v959_v15, 0.0 }
 0x2eb   :  { %v1068_v21 = vmax.f32 %v961_v17, 0.0 }
 0x2ec   :  { %v1139_v22 = vmax.f32 %v1065_v18, %v1067_v19 }
 0x2ed   :  { %v1160_v23 = vmax.f32 %v1066_v20, %v1068_v21  ;;  %v964_v24 = vpop.f32.mrb[52].mxu0 }
 0x2ee   :  { %v965_v25 = vadd.f32 %v964_v24, %v2821_v55  ;;  %v966_v26 = vpop.f32.mrb[53].mxu0 }
 0x2ef   :  { %v967_v28 = vadd.f32 %v966_v26, %v2824_v57  ;;  %v968_v39 = vpop.f32.mrb[54].mxu0 }
 0x2f0   :  { %v1069_v29 = vmax.f32 %v965_v25, 0.0  ;;  %v969_v30 = vadd.f32 %v968_v39, %v2821_v55  ;;  %v970_v31 = vpop.f32.mrb[55].mxu0 }
 0x2f1   :  { %v1070_v32 = vmax.f32 %v967_v28, 0.0  ;;  %v971_v33 = vadd.f32 %v970_v31, %v2824_v57 }
 0x2f2   :  { %v1140_v34 = vmax.f32 %v1139_v22, %v1069_v29  ;;  %v1071_v35 = vmax.f32 %v969_v30, 0.0 }
 0x2f3   :  { %v1161_v36 = vmax.f32 %v1160_v23, %v1070_v32  ;;  %v1072_v49 = vmax.f32 %v971_v33, 0.0 }
 0x2f4   :  { %v1141_v27 = vmax.f32 %v1140_v34, %v1071_v35 }
 0x2f5   :  { %v1162_v37 = vmax.f32 %v1161_v36, %v1072_v49  ;;  %v974_v13 = vpop.f32.mrb[56].mxu0 }
 0x2f6   :  { %v975_v38 = vadd.f32 %v974_v13, %v2821_v55  ;;  %v976_v40 = vpop.f32.mrb[57].mxu0 }
 0x2f7   :  { %v977_v41 = vadd.f32 %v976_v40, %v2824_v57  ;;  %v978_v42 = vpop.f32.mrb[58].mxu0 }
 0x2f8   :  { %v1073_v43 = vmax.f32 %v975_v38, 0.0  ;;  %v979_v44 = vadd.f32 %v978_v42, %v2821_v55  ;;  %v980_v45 = vpop.f32.mrb[59].mxu0 }
 0x2f9   :  { %v1074_v46 = vmax.f32 %v977_v41, 0.0  ;;  %v981_v47 = vadd.f32 %v980_v45, %v2824_v57 }
 0x2fa   :  { %v1142_v48 = vmax.f32 %v1141_v27, %v1073_v43  ;;  %v1075_v51 = vmax.f32 %v979_v44, 0.0 }
 0x2fb   :  { %v1163_v52 = vmax.f32 %v1162_v37, %v1074_v46  ;;  %v1076_v54 = vmax.f32 %v981_v47, 0.0 }
 0x2fc   :  { %v1143_v56 = vmax.f32 %v1142_v48, %v1075_v51 }
 0x2fd   :  { %v1164_v58 = vmax.f32 %v1163_v52, %v1076_v54  ;;  %v984_v59 = vpop.f32.mrb[60].mxu0 }
 0x2fe   :  { %v985_v60 = vadd.f32 %v984_v59, %v2821_v55  ;;  %v986_v61 = vpop.f32.mrb[61].mxu0 }
 0x2ff   :  { %v987_v62 = vadd.f32 %v986_v61, %v2824_v57  ;;  %v988_v63 = vpop.f32.mrb[62].mxu0 }
 0x300   :  { %v1077_v0 = vmax.f32 %v985_v60, 0.0  ;;  %v989_v1 = vadd.f32 %v988_v63, %v2821_v55  ;;  %v990_v2 = vpop.f32.mrb[63].mxu0  ;;  %v1112_v63 = vrot.slane %v2858_v7, 4 }
 0x301   :  { %v1078_v3 = vmax.f32 %v987_v62, 0.0  ;;  %v991_v4 = vadd.f32 %v990_v2, %v2824_v57 }
 0x302   :  { %v1144_v5 = vmax.f32 %v1143_v56, %v1077_v0  ;;  %v1079_v6 = vmax.f32 %v989_v1, 0.0  ;;  %v1133_v1 = vrot.slane %v2860_v8, 4 }
 0x303   :  { %v1165_v9 = vmax.f32 %v1164_v58, %v1078_v3  ;;  %v1080_v10 = vmax.f32 %v991_v4, 0.0 }
 0x304   :  { %v1145_v11 = vmax.f32 %v1144_v5, %v1079_v6 }
 0x305   :  { %v1166_v12 = vmax.f32 %v1165_v9, %v1080_v10  ;;  %v994_v14 = vpop.f32.mrb[64].mxu0  ;;  %v1113_v10 = vmax.f32 %v2858_v7, %v1112_v63  ;;  %v2385_v63 = vld [vmem:[#allocation2 + $0x280] ss:$8 sps:$4 sm:$0xff]  }
 0x306   :  { %v995_v15 = vadd.f32 %v994_v14, %v2821_v55  ;;  %v996_v16 = vpop.f32.mrb[65].mxu0 }
 0x307   :  { %v997_v17 = vadd.f32 %v996_v16, %v2824_v57  ;;  %v998_v18 = vpop.f32.mrb[66].mxu0 }
 0x308   :  { %v1081_v19 = vmax.f32 %v995_v15, 0.0  ;;  %v999_v20 = vadd.f32 %v998_v18, %v2821_v55  ;;  %v1000_v21 = vpop.f32.mrb[67].mxu0  ;;  %v1134_v15 = vmax.f32 %v2860_v8, %v1133_v1  ;;  %v2388_v1 = vld [vmem:[#allocation2 + $0x290] ss:$8 sps:$4 sm:$0xff]  }
 0x309   :  { %v1082_v22 = vmax.f32 %v997_v17, 0.0  ;;  %v1001_v23 = vadd.f32 %v1000_v21, %v2824_v57 }
 0x30a   :  { %v1146_v24 = vmax.f32 %v1145_v11, %v1081_v19  ;;  %v1083_v25 = vmax.f32 %v999_v20, 0.0 }
 0x30b   :  { %v1167_v26 = vmax.f32 %v1166_v12, %v1082_v22  ;;  %v1084_v28 = vmax.f32 %v1001_v23, 0.0  ;;  %v1114_v22 = vrot.slane %v1113_v10, 2 }
 0x30c   :  { %v1147_v39 = vmax.f32 %v1146_v24, %v1083_v25  ;;  %v1135_v24 = vrot.slane %v1134_v15, 2 }
 0x30d   :  { %v1168_v29 = vmax.f32 %v1167_v26, %v1084_v28  ;;  %v1004_v30 = vpop.f32.mrb[68].mxu0  ;;  %v1115_v7 = vmax.f32 %v1113_v10, %v1114_v22  ;;  %v2402_v10 = vld [vmem:[#allocation2 + $0x2d4] ss:$8 sps:$4 sm:$0xff]   ;;  %v2415_v22 = vld [vmem:[#allocation2 + $0x320] ss:$8 sps:$4 sm:$0xff]  }
 0x30e   :  { %v1005_v31 = vadd.f32 %v1004_v30, %v2821_v55  ;;  %v1006_v32 = vpop.f32.mrb[69].mxu0 }
 0x30f   :  { %v1007_v33 = vadd.f32 %v1006_v32, %v2824_v57  ;;  %v1008_v34 = vpop.f32.mrb[70].mxu0  ;;  %v1116_v8 = vrot.slane %v1115_v7, 1 }
 0x310   :  { %v1085_v35 = vmax.f32 %v1005_v31, 0.0  ;;  %v1009_v36 = vadd.f32 %v1008_v34, %v2821_v55  ;;  %v1010_v49 = vpop.f32.mrb[71].mxu0 }
 0x311   :  { %v1086_v27 = vmax.f32 %v1007_v33, 0.0  ;;  %v1011_v37 = vadd.f32 %v1010_v49, %v2824_v57 }
 0x312   :  { %v1148_v13 = vmax.f32 %v1147_v39, %v1085_v35  ;;  %v1087_v38 = vmax.f32 %v1009_v36, 0.0  ;;  %v1117_v36 = vmax.f32 %v1115_v7, %v1116_v8  ;;  %v2424_v7 = vld [vmem:[#allocation2 + $0x350] ss:$8 sps:$4 sm:$0xff]   ;;  %v2433_v8 = vld [vmem:[#allocation2 + $0x380] ss:$8 sps:$4 sm:$0xff]  }
 0x313   :  { %v1169_v40 = vmax.f32 %v1168_v29, %v1086_v27  ;;  %v1088_v41 = vmax.f32 %v1011_v37, 0.0  ;;  %v1136_v29 = vmax.f32 %v1134_v15, %v1135_v24  ;;  %v2408_v15 = vld [vmem:[#allocation2 + $0x2f4] ss:$8 sps:$4 sm:$0xff]   ;;  %v2418_v24 = vld [vmem:[#allocation2 + $0x330] ss:$8 sps:$4 sm:$0xff]  }
 0x314   :  { %v1149_v42 = vmax.f32 %v1148_v13, %v1087_v38 }
 0x315   :  { %v1170_v43 = vmax.f32 %v1169_v40, %v1088_v41  ;;  %v1014_v44 = vpop.f32.mrb[72].mxu0  ;;  %v1137_v33 = vrot.slane %v1136_v29, 1  ;;  %v2361_v41 = vld [vmem:[#allocation2 + $0x200] ss:$8 sps:$4 sm:$0xff]  }
 0x316   :  { %v1015_v45 = vadd.f32 %v1014_v44, %v2821_v55  ;;  %v1016_v46 = vpop.f32.mrb[73].mxu0  ;;  %v2364_v44 = vld [vmem:[#allocation2 + $0x210] ss:$8 sps:$4 sm:$0xff]  }
 0x317   :  { %v1017_v47 = vadd.f32 %v1016_v46, %v2824_v57  ;;  %v1018_v48 = vpop.f32.mrb[74].mxu0  ;;  %v1138_v27 = vmax.f32 %v1136_v29, %v1137_v33  ;;  %v2367_v46 = vld [vmem:[#allocation2 + $0x220] ss:$8 sps:$4 sm:$0xff]   ;;  %v2436_v33 = vld [vmem:[#allocation2 + $0x390] ss:$8 sps:$4 sm:$0xff]  }
 0x318   :  { %v1089_v51 = vmax.f32 %v1015_v45, 0.0  ;;  %v1019_v52 = vadd.f32 %v1018_v48, %v2821_v55  ;;  %v1020_v54 = vpop.f32.mrb[75].mxu0  ;;  %v2369_v45 = vld [vmem:[#allocation2 + $0x224] ss:$8 sps:$4 sm:$0xff]   ;;  %v2370_v48 = vld [vmem:[#allocation2 + $0x230] ss:$8 sps:$4 sm:$0xff]  }
 0x319   :  { %v1090_v56 = vmax.f32 %v1017_v47, 0.0  ;;  %v1021_v58 = vadd.f32 %v1020_v54, %v2824_v57  ;;  %v2372_v47 = vld [vmem:[#allocation2 + $0x234] ss:$8 sps:$4 sm:$0xff]   ;;  %v2427_v29 = vld [vmem:[#allocation2 + $0x360] ss:$8 sps:$4 sm:$0xff]  }
 0x31a   :  { %v1150_v59 = vmax.f32 %v1149_v42, %v1089_v51  ;;  %v1091_v60 = vmax.f32 %v1019_v52, 0.0  ;;  %v2375_v51 = vld [vmem:[#allocation2 + $0x244] ss:$8 sps:$4 sm:$0xff]   ;;  %v2373_v52 = vld [vmem:[#allocation2 + $0x240] ss:$8 sps:$4 sm:$0xff]  }
 0x31b   :  { %v1171_v61 = vmax.f32 %v1170_v43, %v1090_v56  ;;  %v1092_v62 = vmax.f32 %v1021_v58, 0.0  ;;  %v2366_v43 = vld [vmem:[#allocation2 + $0x214] ss:$8 sps:$4 sm:$0xff]   ;;  %v2376_v56 = vld [vmem:[#allocation2 + $0x250] ss:$8 sps:$4 sm:$0xff]  }
 0x31c   :  { %v1151_v0 = vmax.f32 %v1150_v59, %v1091_v60  ;;  %v2378_v54 = vld [vmem:[#allocation2 + $0x254] ss:$8 sps:$4 sm:$0xff]   ;;  %v2381_v58 = vld [vmem:[#allocation2 + $0x264] ss:$8 sps:$4 sm:$0xff]   ;;  %v2379_v59 = vld [vmem:[#allocation2 + $0x260] ss:$8 sps:$4 sm:$0xff]  }
 0x31d   :  { %v1172_v2 = vmax.f32 %v1171_v61, %v1092_v62  ;;  %v1024_v3 = vpop.f32.mrb[76].mxu0  ;;  %v2384_v60 = vld [vmem:[#allocation2 + $0x274] ss:$8 sps:$4 sm:$0xff]   ;;  %v2382_v61 = vld [vmem:[#allocation2 + $0x270] ss:$8 sps:$4 sm:$0xff]  }
 0x31e   :  { %v1025_v4 = vadd.f32 %v1024_v3, %v2821_v55  ;;  %v1026_v5 = vpop.f32.mrb[77].mxu0  ;;  %v2387_v62 = vld [vmem:[#allocation2 + $0x284] ss:$8 sps:$4 sm:$0xff]   ;;  %v2391_v3 = vld [vmem:[#allocation2 + $0x2a0] ss:$8 sps:$4 sm:$0xff]  }
 0x31f   :  { %v1027_v6 = vadd.f32 %v1026_v5, %v2824_v57  ;;  %v1028_v9 = vpop.f32.mrb[78].mxu0  ;;  %v2394_v5 = vld [vmem:[#allocation2 + $0x2b0] ss:$8 sps:$4 sm:$0xff]  }
 0x320   :  { %v1093_v11 = vmax.f32 %v1025_v4, 0.0  ;;  %v1029_v12 = vadd.f32 %v1028_v9, %v2821_v55  ;;  %v1030_v14 = vpop.f32.mrb[79].mxu0  ;;  %v2396_v4 = vld [vmem:[#allocation2 + $0x2b4] ss:$8 sps:$4 sm:$0xff]   ;;  %v2397_v9 = vld [vmem:[#allocation2 + $0x2c0] ss:$8 sps:$4 sm:$0xff]  }
 0x321   :  { %v1094_v16 = vmax.f32 %v1027_v6, 0.0  ;;  %v1031_v17 = vadd.f32 %v1030_v14, %v2824_v57  ;;  %v2399_v6 = vld [vmem:[#allocation2 + $0x2c4] ss:$8 sps:$4 sm:$0xff]   ;;  %v2403_v14 = vld [vmem:[#allocation2 + $0x2e0] ss:$8 sps:$4 sm:$0xff]  }
 0x322   :  { %v1152_v18 = vmax.f32 %v1151_v0, %v1093_v11  ;;  %v1095_v19 = vmax.f32 %v1029_v12, 0.0  ;;  %v2390_v0 = vld [vmem:[#allocation2 + $0x294] ss:$8 sps:$4 sm:$0xff]   ;;  %v2400_v11 = vld [vmem:[#allocation2 + $0x2d0] ss:$8 sps:$4 sm:$0xff]  }
 0x323   :  { %v1173_v20 = vmax.f32 %v1172_v2, %v1094_v16  ;;  %v1096_v21 = vmax.f32 %v1031_v17, 0.0  ;;  %v2393_v2 = vld [vmem:[#allocation2 + $0x2a4] ss:$8 sps:$4 sm:$0xff]   ;;  %v2406_v16 = vld [vmem:[#allocation2 + $0x2f0] ss:$8 sps:$4 sm:$0xff]  }
 0x324   :  { %v1153_v23 = vmax.f32 %v1152_v18, %v1095_v19  ;;  %v2405_v12 = vld [vmem:[#allocation2 + $0x2e4] ss:$8 sps:$4 sm:$0xff]   ;;  %v2409_v17 = vld [vmem:[#allocation2 + $0x300] ss:$8 sps:$4 sm:$0xff]   ;;  %v2414_v19 = vld [vmem:[#allocation2 + $0x314] ss:$8 sps:$4 sm:$0xff]  }
 0x325   :  { %v1174_v25 = vmax.f32 %v1173_v20, %v1096_v21  ;;  %v2411_v18 = vld [vmem:[#allocation2 + $0x304] ss:$8 sps:$4 sm:$0xff]   ;;  %v2412_v20 = vld [vmem:[#allocation2 + $0x310] ss:$8 sps:$4 sm:$0xff]  }
 0x326   :  { %v1154_v26 = vrot.slane %v1153_v23, 4  ;;  %1903 = vmatprep.subr.bf16.mxu0 %v2411_v18  ;;  %v2417_v21 = vld [vmem:[#allocation2 + $0x324] ss:$8 sps:$4 sm:$0xff]  }
 0x327   :  { %v1175_v28 = vrot.slane %v1174_v25, 4  ;;  %1904 = vmatpush1.bf16.msra.mxu0 %v2409_v17 }
 0x328   :  { %v1155_v39 = vmax.f32 %v1153_v23, %v1154_v26  ;;  %1905 = vmatprep.subr.bf16.mxu0 %v2414_v19  ;;  %v2420_v23 = vld [vmem:[#allocation2 + $0x334] ss:$8 sps:$4 sm:$0xff]   ;;  %v2421_v26 = vld [vmem:[#allocation2 + $0x340] ss:$8 sps:$4 sm:$0xff]  }
 0x329   :  { %v1176_v55 = vmax.f32 %v1174_v25, %v1175_v28  ;;  %v2423_v25 = vld [vmem:[#allocation2 + $0x344] ss:$8 sps:$4 sm:$0xff]   ;;  %v2426_v28 = vld [vmem:[#allocation2 + $0x354] ss:$8 sps:$4 sm:$0xff]  }
 0x32a   :  { %v1156_v30 = vrot.slane %v1155_v39, 2 }
 0x32b   :  { %v1177_v31 = vrot.slane %v1176_v55, 2  ;;  %1906 = vmatpush1.bf16.msra.mxu0 %v2412_v20 }
 0x32c   :  { %v1157_v32 = vmax.f32 %v1155_v39, %v1156_v30  ;;  %1907 = vmatprep.subr.bf16.mxu0 %v2417_v21  ;;  %v2429_v39 = vld [vmem:[#allocation2 + $0x364] ss:$8 sps:$4 sm:$0xff]   ;;  %v2430_v30 = vld [vmem:[#allocation2 + $0x370] ss:$8 sps:$4 sm:$0xff]  }
 0x32d   :  { %v1178_v57 = vmax.f32 %v1176_v55, %v1177_v31  ;;  %v2432_v55 = vld [vmem:[#allocation2 + $0x374] ss:$8 sps:$4 sm:$0xff]   ;;  %v2435_v31 = vld [vmem:[#allocation2 + $0x384] ss:$8 sps:$4 sm:$0xff]  }
 0x32e   :  { %v1158_v34 = vrot.slane %v1157_v32, 1 }
 0x32f   :  { %v1179_v35 = vrot.slane %v1178_v57, 1  ;;  %1908 = vmatpush1.bf16.msra.mxu0 %v2415_v22 }
 0x330   :  { %v1159_v49 = vmax.f32 %v1157_v32, %v1158_v34  ;;  %1909 = vmatprep.subr.bf16.mxu0 %v2420_v23  ;;  %v2438_v32 = vld [vmem:[#allocation2 + $0x394] ss:$8 sps:$4 sm:$0xff]   ;;  %v2439_v34 = vld [vmem:[#allocation2 + $0x3a0] ss:$8 sps:$4 sm:$0xff]  }
 0x331   :  { %v1180_v37 = vmax.f32 %v1178_v57, %v1179_v35  ;;  %v2441_v57 = vld [vmem:[#allocation2 + $0x3a4] ss:$8 sps:$4 sm:$0xff]   ;;  %v2444_v35 = vld [vmem:[#allocation2 + $0x3b4] ss:$8 sps:$4 sm:$0xff]  }
 0x332   :  { %v1186_v13 = vsel %vm1185_vm2, %v1159_v49, %v1117_v36  ;;  %v2442_v36 = vld [vmem:[#allocation2 + $0x3b0] ss:$8 sps:$4 sm:$0xff]   ;;  %v2447_v49 = vld [vmem:[#allocation2 + $0x3c4] ss:$8 sps:$4 sm:$0xff]  }
 0x333   :  { %v1187_v38 = vsel %vm1185_vm2, %v1180_v37, %v1138_v27  ;;  %v2067_v42 = vpack.c.bf16 %v1186_v13, %v1186_v13  ;;  %1910 = vmatpush1.bf16.msra.mxu0 %v2418_v24  ;;  %v2445_v27 = vld [vmem:[#allocation2 + $0x3c0] ss:$8 sps:$4 sm:$0xff]   ;;  %v2450_v37 = vld [vmem:[#allocation2 + $0x3d4] ss:$8 sps:$4 sm:$0xff]   ;;  %v2448_v13 = vld [vmem:[#allocation2 + $0x3d0] ss:$8 sps:$4 sm:$0xff]  }
 0x334   :  { %v2064_v40 = vpack.c.bf16 %v1187_v38, %v1187_v38  ;;  %1911 = vmatprep.subr.bf16.mxu0 %v2423_v25  ;;  %v2453_v38 = vld [vmem:[#allocation2 + $0x3e4] ss:$8 sps:$4 sm:$0xff]  }
 0x336   :  { %2065 = vmatprep.mubr.msk.bf16.mxu1 %vm2063_vm4, %v2064_v40  ;;  %v2451_v40 = vld [vmem:[#allocation2 + $0x3e0] ss:$8 sps:$4 sm:$0xff]  }
 0x337   :  { %2068 = vmatmul.mubr.msk.bf16.vlgmr.msra.gmra.mrb[48].mxu1 %vm2063_vm4, %v2067_v42  ;;  %1912 = vmatpush1.bf16.msra.mxu0 %v2421_v26 }
 0x338   :  { %1653 = vmatpush1.bf16.msra.mxu1 %v2361_v41  ;;  %1913 = vmatprep.subr.bf16.mxu0 %v2426_v28  ;;  %v2030_v41 = vld [vmem:[%s2929_s4 + $0x3] ss:$8 sm:$0x3] }
 0x339   :  { %1654 = vmatprep.subr.bf16.mxu1 %v2366_v43  ;;  %v1234_v42 = vrot.slane %v2030_v41, %v2813_v50  ;;  %v1238_v43 = vrot.slane %v2030_v41, %v2818_v53 }
 0x33b   :  { %1914 = vmatpush1.bf16.msra.mxu0 %v2424_v7 }
 0x33c   :  { %1655 = vmatpush1.bf16.msra.mxu1 %v2364_v44  ;;  %1915 = vmatprep.subr.bf16.mxu0 %v2429_v39 }
 0x33d   :  { %1656 = vmatprep.subr.bf16.mxu1 %v2369_v45 }
 0x33f   :  { %1916 = vmatpush1.bf16.msra.mxu0 %v2427_v29 }
 0x340   :  { %1657 = vmatpush1.bf16.msra.mxu1 %v2367_v46  ;;  %1917 = vmatprep.subr.bf16.mxu0 %v2432_v55 }
 0x341   :  { %1658 = vmatprep.subr.bf16.mxu1 %v2372_v47 }
 0x343   :  { %1918 = vmatpush1.bf16.msra.mxu0 %v2430_v30 }
 0x344   :  { %1659 = vmatpush1.bf16.msra.mxu1 %v2370_v48  ;;  %1919 = vmatprep.subr.bf16.mxu0 %v2435_v31 }
 0x345   :  { %1660 = vmatprep.subr.bf16.mxu1 %v2375_v51 }
 0x347   :  { %1920 = vmatpush1.bf16.msra.mxu0 %v2433_v8 }
 0x348   :  { %1661 = vmatpush1.bf16.msra.mxu1 %v2373_v52  ;;  %1921 = vmatprep.subr.bf16.mxu0 %v2438_v32 }
 0x349   :  { %1662 = vmatprep.subr.bf16.mxu1 %v2378_v54 }
 0x34b   :  { %1922 = vmatpush1.bf16.msra.mxu0 %v2436_v33 }
 0x34c   :  { %1663 = vmatpush1.bf16.msra.mxu1 %v2376_v56  ;;  %1923 = vmatprep.subr.bf16.mxu0 %v2441_v57 }
 0x34d   :  { %1664 = vmatprep.subr.bf16.mxu1 %v2381_v58 }
 0x34f   :  { %1924 = vmatpush1.bf16.msra.mxu0 %v2439_v34 }
 0x350   :  { %1665 = vmatpush1.bf16.msra.mxu1 %v2379_v59  ;;  %1925 = vmatprep.subr.bf16.mxu0 %v2444_v35  ;;  %v2456_v59 = vld [vmem:[#allocation2 + $0x3f4] ss:$8 sps:$4 sm:$0xff]  }
 0x351   :  { %1666 = vmatprep.subr.bf16.mxu1 %v2384_v60  ;;  %v2454_v60 = vld [vmem:[#allocation2 + $0x3f0] ss:$8 sps:$4 sm:$0xff]  }
 0x353   :  { %1926 = vmatpush1.bf16.msra.mxu0 %v2442_v36 }
 0x354   :  { %1667 = vmatpush1.bf16.msra.mxu1 %v2382_v61  ;;  %1927 = vmatprep.subr.bf16.mxu0 %v2447_v49  ;;  %v2069_v61 = vld [vmem:[%s2929_s4 + $0x4] ss:$8 sm:$0x3] }
 0x355   :  { %1668 = vmatprep.subr.bf16.mxu1 %v2387_v62  ;;  %v1485_v62 = vrot.slane %v2069_v61, %v2813_v50 }
 0x357   :  { %1928 = vmatpush1.bf16.msra.mxu0 %v2445_v27 }
 0x358   :  { %1669 = vmatpush1.bf16.msra.mxu1 %v2385_v63  ;;  %1929 = vmatprep.subr.bf16.mxu0 %v2450_v37  ;;  %v1489_v63 = vrot.slane %v2069_v61, %v2818_v53 }
 0x359   :  { %1670 = vmatprep.subr.bf16.mxu1 %v2390_v0 }
 0x35b   :  { %1930 = vmatpush1.bf16.msra.mxu0 %v2448_v13 }
 0x35c   :  { %1671 = vmatpush1.bf16.msra.mxu1 %v2388_v1  ;;  %1931 = vmatprep.subr.bf16.mxu0 %v2453_v38 }
 0x35d   :  { %1672 = vmatprep.subr.bf16.mxu1 %v2393_v2 }
 0x35f   :  { %1932 = vmatpush1.bf16.msra.mxu0 %v2451_v40 }
 0x360   :  { %1673 = vmatpush1.bf16.msra.mxu1 %v2391_v3  ;;  %1933 = vmatprep.subr.bf16.mxu0 %v2456_v59 }
 0x361   :  { %1674 = vmatprep.subr.bf16.mxu1 %v2396_v4 }
 0x363   :  { %1934 = vmatpush1.bf16.msra.mxu0 %v2454_v60 }
 0x364   :  { %1675 = vmatpush1.bf16.msra.mxu1 %v2394_v5 }
 0x365   :  { %1676 = vmatprep.subr.bf16.mxu1 %v2399_v6 }
 0x368   :  { %1677 = vmatpush1.bf16.msra.mxu1 %v2397_v9 }
 0x369   :  { %1678 = vmatprep.subr.bf16.mxu1 %v2402_v10 }
 0x36c   :  { %1679 = vmatpush1.bf16.msra.mxu1 %v2400_v11 }
 0x36d   :  { %1680 = vmatprep.subr.bf16.mxu1 %v2405_v12  ;;  %v2102_v12 = vld [vmem:[%s2929_s4 + $0x5] ss:$8 sm:$0x3] }
 0x370   :  { %1681 = vmatpush1.bf16.msra.mxu1 %v2403_v14  ;;  %v1736_v14 = vrot.slane %v2102_v12, %v2813_v50 }
 0x371   :  { %1682 = vmatprep.subr.bf16.mxu1 %v2408_v15  ;;  %v1740_v15 = vrot.slane %v2102_v12, %v2818_v53 }
 0x374   :  { %1683 = vmatpush1.bf16.msra.mxu1 %v2406_v16 }
 0x40a   :  { %v1435_v44 = vpop.f32.mrb[48].mxu1 }
 0x40b   :  { %v1436_v45 = vadd.f32 %v1435_v44, %v1234_v42  ;;  %v1437_v46 = vpop.f32.mrb[49].mxu1 }
 0x40c   :  { %v1438_v47 = vadd.f32 %v1437_v46, %v1238_v43  ;;  %v1439_v48 = vpop.f32.mrb[50].mxu1 }
 0x40d   :  { %v1442_v51 = vmax.f32 %v1436_v45, 0.0  ;;  %v1440_v52 = vpop.f32.mrb[51].mxu1 }
 0x40e   :  { %v1443_v54 = vmax.f32 %v1438_v47, 0.0 }
 0x40f   :  { %v1444_v58 = vpack.c.bf16 %v1442_v51, %v1442_v51 }
 0x410   :  { %v1445_v56 = vpack.c.bf16 %v1443_v54, %v1443_v54 }
 0x412   :  { %1684 = vmatprep.mubr.bf16.mxu1 %v1445_v56 }
 0x413   :  { %1685 = vmatmul.mubr.bf16.vlgmr.msra.gmra.mrb[52].mxu1 %v1444_v58 }
 0x4e6   :  { %v1686_v0 = vpop.f32.mrb[52].mxu1 }
 0x4e7   :  { %v1687_v1 = vadd.f32 %v1686_v0, %v1485_v62  ;;  %v1688_v2 = vpop.f32.mrb[53].mxu1 }
 0x4e8   :  { %v1689_v3 = vadd.f32 %v1688_v2, %v1489_v63  ;;  %v1690_v4 = vpop.f32.mrb[54].mxu1 }
 0x4e9   :  { %v1693_v5 = vmax.f32 %v1687_v1, 0.0  ;;  %v1691_v6 = vpop.f32.mrb[55].mxu1 }
 0x4ea   :  { %v1694_v9 = vmax.f32 %v1689_v3, 0.0 }
 0x4eb   :  { %v1695_v11 = vpack.c.bf16 %v1693_v5, %v1693_v5 }
 0x4ec   :  { %v1696_v10 = vpack.c.bf16 %v1694_v9, %v1694_v9 }
 0x4ee   :  { %1935 = vmatprep.mubr.bf16.mxu0 %v1696_v10 }
 0x4ef   :  { %1936 = vmatmul.mubr.bf16.vlgmr.msra.gmra.mrb[80].mxu0 %v1695_v11 }
 0x5c2   :  { %v1937_v16 = vpop.f32.mrb[80].mxu0 }
 0x5c3   :  { %v1938_v17 = vadd.f32 %v1937_v16, %v1736_v14  ;;  %v1939_v18 = vpop.f32.mrb[81].mxu0 }
 0x5c4   :  { %v1940_v19 = vadd.f32 %v1939_v18, %v1740_v15  ;;  %v1941_v20 = vpop.f32.mrb[82].mxu0 }
 0x5c5   :  { %1944 = vst [vmem:[#allocation5] sm:$0xff] %v1938_v17  ;;  %v1942_v21 = vpop.f32.mrb[83].mxu0 }
 0x5c6   :  { %1945 = vst [vmem:[#allocation5 + $0x8] sm:$0xff] %v1940_v19 }
 0x5c7   :  { %2490 = shalt.err (!%p2487_p12)
}
 0x5c8   :  { %s2491_s3 = scalar_lea.hbm %s2930_s5, 256 }
 0x5c9   :  { %p2492_p13 = scmp.ne.s32.totalorder %s2930_s5, %s2491_s3  ;;  %p2495_p0 = scmp.lt.u32.totalorder %s2491_s3, %s2930_s5 }
 0x5cb   :  { %p2497_p1 = pnand %p2495_p0, %p2492_p13 }
 0x5cd   :  { %2500 = shalt.err (!%p2497_p1)
}
 0x5ce   :  { %1955 = dma.vmem_to_hbm [thread:$0]  %s1953_s11, 256, %s2930_s5, [#allocation4]  }
 0x5cf   :  { %2503 = dma.done.wait [#allocation4], 256  }
 0x5d0   :  { %2504 = vsyncadd [#allocation4], 4294967040 }
 0x5d1   :  { %1959 = vsyncpa [#allocation3], 1 }
 0x5d2   :  { %1960 = vsyncpa [#allocation4], 1 }

</bundles_post_ra>
